<compile_context>
chip_gen: v5e
topology: v5e:2x2
jax: 0.10.0
libtpu: 0.0.40
codegen_flags: <defaults>
</compile_context>

<pallas_src>
import math

import jax
import jax.numpy as jnp
from jax.experimental import pallas as pl
from jax.experimental.pallas import tpu as pltpu

LN_EPS = 1e-5


def _round_up(n, m):
    return ((n + m - 1) // m) * m


def _layernorm(x, w, b, d_real, mask):
    """PyTorch LayerNorm (biased variance, eps=1e-5) over the last dim of a (R, Dp) slab.
    When Dp > d_real (lane padding) statistics use only the real columns via `mask`."""
    inv_d = 1.0 / float(d_real)
    if mask is None:
        mu = jnp.sum(x, axis=-1, keepdims=True) * inv_d
        xc = x - mu
        var = jnp.sum(xc * xc, axis=-1, keepdims=True) * inv_d
    else:
        mu = jnp.sum(x * mask, axis=-1, keepdims=True) * inv_d
        xc = x - mu
        var = jnp.sum(xc * xc * mask, axis=-1, keepdims=True) * inv_d
    return xc * jax.lax.rsqrt(var + LN_EPS) * w + b


def _gelu_exact(x):
    # torch.nn.GELU() default = exact erf formulation (kept for semantic fidelity).
    return 0.5 * x * (1.0 + jax.lax.erf(x * (1.0 / math.sqrt(2.0))))


def make_encoder_kernel(d_real, do_real, s_real):
    """Kernel factory; d_real/do_real/s_real are the *unpadded* sizes (static)."""

    def encoder_kernel(x_ref,
                       ln1_w_ref, ln1_b_ref,
                       w_qkv_ref,                 # (Dp, 3*Dop) bf16, fused + pre-transposed
                       w_lin_ref, b_lin_ref,      # (Dop, Dp) bf16, (1, Dp) f32
                       w1_ref, b1_ref,            # (Dp, Dp)  bf16, (1, Dp) f32
                       w2_ref, b2_ref,            # (Dp, Dp)  bf16, (1, Dp) f32
                       ln2_w_ref, ln2_b_ref,
                       o_ref):
        Bt, Sp, Dp = x_ref.shape
        Dop = w_lin_ref.shape[0]
        R = Bt * Sp

        # Sp % 8 == 0 and Dp % 128 == 0 -> this reshape is tile-boundary safe.
        x = x_ref[...].reshape(R, Dp)

        if Dp != d_real:
            col = jax.lax.broadcasted_iota(jnp.int32, (1, Dp), 1)
            dmask = (col < d_real).astype(jnp.float32)
        else:
            dmask = None

        # ---- pre-LayerNorm (f32 stats over the real D columns only) ----
        h = _layernorm(x, ln1_w_ref[...], ln1_b_ref[...], d_real, dmask)
        h_b = h.astype(jnp.bfloat16)

        # ---- fused QKV projection: one lane-dense (R, 3*Dop) MXU pass ----
        qkv = jnp.dot(h_b, w_qkv_ref[...], preferred_element_type=jnp.float32)
        scale = 1.0 / math.sqrt(float(do_real))          # scale folded into q (small slab)
        q = (qkv[:, 0:Dop] * scale).astype(jnp.bfloat16).reshape(Bt, Sp, Dop)
        k = qkv[:, Dop:2 * Dop].astype(jnp.bfloat16).reshape(Bt, Sp, Dop)
        v = qkv[:, 2 * Dop:3 * Dop].astype(jnp.bfloat16).reshape(Bt, Sp, Dop)

        # ---- scaled dot-product attention (NT contraction, no key transpose) ----
        s = jnp.einsum('bqd,bkd->bqk', q, k, preferred_element_type=jnp.float32)
        if Sp != s_real:
            kcol = jax.lax.broadcasted_iota(jnp.int32, (1, 1, Sp), 2)
            s = jnp.where(kcol < s_real, s, -1e30)       # padded keys never attended
        s = s - jnp.max(s, axis=-1, keepdims=True)
        p = jnp.exp(s)
        p = p * pl.reciprocal(jnp.sum(p, axis=-1, keepdims=True), approx=False)
        attn = jnp.einsum('bqk,bkd->bqd', p.astype(jnp.bfloat16), v,
                          preferred_element_type=jnp.float32).reshape(R, Dop)

        # ---- output projection + residual + LayerNorm ----
        attn_out = jnp.dot(attn.astype(jnp.bfloat16), w_lin_ref[...],
                           preferred_element_type=jnp.float32) + b_lin_ref[...]
        r = attn_out + x
        y = _layernorm(r, ln2_w_ref[...], ln2_b_ref[...], d_real, dmask)

        # ---- MLP: Linear(D,D) -> exact GELU -> Linear(D,D), residual ----
        m = jnp.dot(y.astype(jnp.bfloat16), w1_ref[...],
                    preferred_element_type=jnp.float32) + b1_ref[...]
        m = _gelu_exact(m)
        m = jnp.dot(m.astype(jnp.bfloat16), w2_ref[...],
                    preferred_element_type=jnp.float32) + b2_ref[...]

        out = y + m
        # Dp is a multiple of 128 -> lane-dense, un-masked output store.
        o_ref[...] = out.reshape(Bt, Sp, Dp).astype(o_ref.dtype)

    return encoder_kernel


def _vmem_capacity_bytes():
    """Generation-aware VMEM capacity (128 MiB v5e/v6e, 64 MiB per TC on v7x)."""
    try:
        info = pltpu.get_tpu_info()
        cap = getattr(info, "vmem_capacity_bytes", None)
        if cap:
            return int(cap)
    except Exception:
        pass
    return 64 << 20   # conservative fallback = v7x per-TensorCore VMEM


def _choose_batch_block(B, Sp, Dp, act_block_bytes, target_rows=256, min_steps=2):
    """Largest batch block whose f32 activation block fits the budget, aiming for
    >= target_rows MXU rows per step, while keeping >= min_steps grid steps so the
    pipeline / both v7x TensorCores stay busy."""
    divisors = [d for d in range(1, B + 1) if B % d == 0]
    fitting = [d for d in divisors if d * Sp * Dp * 4 <= act_block_bytes] or [1]
    bt = next((d for d in fitting if d * Sp >= target_rows), fitting[-1])
    while B // bt < min_steps and bt > 1:
        bt = max(d for d in divisors if d < bt)
    return bt


def _pad2(a, rows, cols):
    return jnp.pad(a, ((0, rows - a.shape[0]), (0, cols - a.shape[1])))


def encoder_forward(x, params):
    """x: (B, S, D) float32.  params: dict of weights in PyTorch (out, in) layout."""
    B, S, D = x.shape
    Do = params["w_lin"].shape[1]

    # ---- pad to TPU-friendly shapes: D, Do -> multiples of 128; S -> multiple of 8 ----
    Dp = _round_up(max(D, 128), 128)
    Dop = _round_up(max(Do, 128), 128)
    Sp = _round_up(S, 8)

    xp = jnp.pad(x, ((0, 0), (0, Sp - S), (0, Dp - D)))

    # ---- one-time weight prep: fused QKV, (in, out) layout, bf16 mats / f32 vecs ----
    w_qkv_t = jnp.transpose(params["w_qkv"])                              # (D, 3*Do)
    w_qkv_p = jnp.concatenate(
        [_pad2(w_qkv_t[:, i * Do:(i + 1) * Do], Dp, Dop) for i in range(3)],
        axis=1).astype(jnp.bfloat16)                                      # (Dp, 3*Dop)
    w_lin_p = _pad2(jnp.transpose(params["w_lin"]), Dop, Dp).astype(jnp.bfloat16)
    w1_p = _pad2(jnp.transpose(params["w1"]), Dp, Dp).astype(jnp.bfloat16)
    w2_p = _pad2(jnp.transpose(params["w2"]), Dp, Dp).astype(jnp.bfloat16)

    def pad_vec(v):
        return _pad2(v.astype(jnp.float32), 1, Dp)

    ln1_w, ln1_b = pad_vec(params["ln1_w"]), pad_vec(params["ln1_b"])
    ln2_w, ln2_b = pad_vec(params["ln2_w"]), pad_vec(params["ln2_b"])
    b_lin, b1, b2 = pad_vec(params["b_lin"]), pad_vec(params["b1"]), pad_vec(params["b2"])

    vmem_cap = _vmem_capacity_bytes()
    Bt = _choose_batch_block(B, Sp, Dp, act_block_bytes=vmem_cap // 16)
    grid = (B // Bt,)
    R = Bt * Sp

    kernel = make_encoder_kernel(D, Do, S)

    def run(weight_pipeline_mode):
        def rep_spec(shape):
            nd = len(shape)
            if weight_pipeline_mode is None:
                return pl.BlockSpec(shape, lambda b, _nd=nd: (0,) * _nd)
            return pl.BlockSpec(shape, lambda b, _nd=nd: (0,) * _nd,
                                pipeline_mode=weight_pipeline_mode)

        in_specs = [
            pl.BlockSpec((Bt, Sp, Dp), lambda b: (b, 0, 0)),              # x
            rep_spec((1, Dp)), rep_spec((1, Dp)),                         # ln1 w, b
            rep_spec((Dp, 3 * Dop)),                                      # fused QKV weight
            rep_spec((Dop, Dp)), rep_spec((1, Dp)),                       # w_lin, b_lin
            rep_spec((Dp, Dp)), rep_spec((1, Dp)),                        # mlp w1, b1
            rep_spec((Dp, Dp)), rep_spec((1, Dp)),                        # mlp w2, b2
            rep_spec((1, Dp)), rep_spec((1, Dp)),                         # ln2 w, b
        ]

        # ---- advisory cost estimate (padded problem is what actually runs) ----
        flops = 2 * B * Sp * (3 * Dp * Dop + 2 * Sp * Dop + Dop * Dp + 2 * Dp * Dp)
        transcendentals = B * Sp * (Sp + Dp)                              # softmax exp + GELU erf
        weight_bytes = (Dp * 3 * Dop + Dop * Dp + 2 * Dp * Dp) * 2 + 8 * Dp * 4
        bytes_accessed = 2 * B * Sp * Dp * 4 + weight_bytes
        cost = pl.CostEstimate(flops=flops, transcendentals=transcendentals,
                               bytes_accessed=bytes_accessed)

        # ---- VMEM budget: weights (x buffering), in/out act blocks, live intermediates
        #      (f32 h/qkv/attn/r/y/m/out + scores/probs, plus their bf16 copies) ----
        wbuf = 1 if weight_pipeline_mode is not None else 2
        act_block = Bt * Sp * Dp * 4
        f32_interm = R * (5 * Dp + 4 * Dop) * 4 + 2 * Bt * Sp * Sp * 4
        bf16_interm = R * (2 * Dp + 4 * Dop) * 2 + Bt * Sp * Sp * 2
        needed = wbuf * weight_bytes + 4 * act_block + f32_interm + bf16_interm
        vmem_limit = int(min(max(needed + (8 << 20), 32 << 20), vmem_cap * 3 // 4))

        out_p = pl.pallas_call(
            kernel,
            out_shape=jax.ShapeDtypeStruct((B, Sp, Dp), x.dtype),
            grid=grid,
            in_specs=in_specs,
            out_specs=pl.BlockSpec((Bt, Sp, Dp), lambda b: (b, 0, 0)),
            compiler_params=pltpu.CompilerParams(
                dimension_semantics=("parallel",),
                vmem_limit_bytes=vmem_limit),
            cost_estimate=cost,
        )(
            xp,
            ln1_w, ln1_b,
            w_qkv_p,
            w_lin_p, b_lin,
            w1_p, b1,
            w2_p, b2,
            ln2_w, ln2_b,
        )
        return jax.block_until_ready(out_p)

    # Prefer single-buffered resident weights; fall back to default buffering if the
    # installed Pallas version rejects Buffered(1).
    modes = []
    try:
        modes.append(pl.Buffered(1))
    except Exception:
        pass
    modes.append(None)

    out_p, last_err = None, None
    for mode in modes:
        try:
            out_p = run(mode)
            break
        except Exception as e:  # fall back to the known-good default-buffered path
            last_err = e
    if out_p is None:
        raise last_err

    return out_p[:, :S, :D]


def init_params(key, input_dim, num_heads=1):
    D = input_dim
    Do = D * num_heads
    ks = jax.random.split(key, 6)
    scale = 0.02
    return {
        "ln1_w": jnp.ones((1, D), jnp.float32),
        "ln1_b": jnp.zeros((1, D), jnp.float32),
        "w_qkv": scale * jax.random.normal(ks[0], (3 * Do, D), jnp.float32),  # (out, in)
        "w_lin": scale * jax.random.normal(ks[1], (D, Do), jnp.float32),      # (out, in)
        "b_lin": scale * jax.random.normal(ks[2], (1, D), jnp.float32),
        "w1": scale * jax.random.normal(ks[3], (D, D), jnp.float32),
        "b1": jnp.zeros((1, D), jnp.float32),
        "w2": scale * jax.random.normal(ks[4], (D, D), jnp.float32),
        "b2": jnp.zeros((1, D), jnp.float32),
        "ln2_w": jnp.ones((1, D), jnp.float32),
        "ln2_b": jnp.zeros((1, D), jnp.float32),
    }


def encoder_reference(x, p):
    """Pure-JAX f32 reference mirroring the PyTorch forward, for sanity checking."""
    def ln(t, w, b):
        mu = t.mean(-1, keepdims=True)
        var = ((t - mu) ** 2).mean(-1, keepdims=True)
        return (t - mu) / jnp.sqrt(var + LN_EPS) * w + b

    Do = p["w_lin"].shape[1]
    h = ln(x, p["ln1_w"], p["ln1_b"])
    qkv = jnp.einsum("bsd,od->bso", h, p["w_qkv"])
    q, k, v = qkv[..., :Do], qkv[..., Do:2 * Do], qkv[..., 2 * Do:]
    s = jnp.einsum("bqd,bkd->bqk", q, k) / math.sqrt(Do)
    a = jax.nn.softmax(s, axis=-1)
    attn = jnp.einsum("bqk,bkd->bqd", a, v)
    out = jnp.einsum("bso,do->bsd", attn, p["w_lin"]) + p["b_lin"]
    r = out + x
    y = ln(r, p["ln2_w"], p["ln2_b"])
    m = jnp.einsum("bsd,od->bso", y, p["w1"]) + p["b1"]
    m = jax.nn.gelu(m, approximate=False)
    m = jnp.einsum("bsd,od->bso", m, p["w2"]) + p["b2"]
    return y + m


if __name__ == "__main__":
    key = jax.random.PRNGKey(0)
    k_x, k_p = jax.random.split(key)

    B, S, D, H = 2, 8, 32, 1          # batch, seq, input_dim, num_heads
    x = jax.random.normal(k_x, (B, S, D), jnp.float32)
    params = init_params(k_p, D, H)

    out = jax.block_until_ready(encoder_forward(x, params))
    ref = encoder_reference(x, params)

    assert out.shape == (B, S, D)
    # bf16 matmul operands (f32 accumulation) -> loosened tolerance.
    assert jnp.allclose(out, ref, atol=1e-2, rtol=1e-2), "mismatch vs reference"

    print("KERNEL_OK")
</pallas_src>

<mosaic_0001>
module attributes {stable_mosaic.version = 11 : i64} {
  func.func @encoder_kernel(%arg0: i32, %arg1: memref<1x8x128xf32, #tpu.memory_space<vmem>>, %arg2: memref<1x128xf32, #tpu.memory_space<vmem>>, %arg3: memref<1x128xf32, #tpu.memory_space<vmem>>, %arg4: memref<128x384xbf16, #tpu.memory_space<vmem>>, %arg5: memref<128x128xbf16, #tpu.memory_space<vmem>>, %arg6: memref<1x128xf32, #tpu.memory_space<vmem>>, %arg7: memref<128x128xbf16, #tpu.memory_space<vmem>>, %arg8: memref<1x128xf32, #tpu.memory_space<vmem>>, %arg9: memref<128x128xbf16, #tpu.memory_space<vmem>>, %arg10: memref<1x128xf32, #tpu.memory_space<vmem>>, %arg11: memref<1x128xf32, #tpu.memory_space<vmem>>, %arg12: memref<1x128xf32, #tpu.memory_space<vmem>>, %arg13: memref<1x8x128xf32, #tpu.memory_space<vmem>>) attributes {dimension_semantics = [#tpu.dimension_semantics<parallel>], iteration_bounds = array<i64: 2>, scalar_prefetch = 0 : i64, scratch_operands = 0 : i64, tpu.core_type = #tpu.core_type<tc>, window_params = [{transform_indices = @transform_0, window_bounds = array<i64: 1, 8, 128>}, {pipeline_mode = #tpu.pipeline_mode<synchronous>, transform_indices = @transform_1, window_bounds = array<i64: 1, 128>}, {pipeline_mode = #tpu.pipeline_mode<synchronous>, transform_indices = @transform_2, window_bounds = array<i64: 1, 128>}, {pipeline_mode = #tpu.pipeline_mode<synchronous>, transform_indices = @transform_3, window_bounds = array<i64: 128, 384>}, {pipeline_mode = #tpu.pipeline_mode<synchronous>, transform_indices = @transform_4, window_bounds = array<i64: 128, 128>}, {pipeline_mode = #tpu.pipeline_mode<synchronous>, transform_indices = @transform_5, window_bounds = array<i64: 1, 128>}, {pipeline_mode = #tpu.pipeline_mode<synchronous>, transform_indices = @transform_6, window_bounds = array<i64: 128, 128>}, {pipeline_mode = #tpu.pipeline_mode<synchronous>, transform_indices = @transform_7, window_bounds = array<i64: 1, 128>}, {pipeline_mode = #tpu.pipeline_mode<synchronous>, transform_indices = @transform_8, window_bounds = array<i64: 128, 128>}, {pipeline_mode = #tpu.pipeline_mode<synchronous>, transform_indices = @transform_9, window_bounds = array<i64: 1, 128>}, {pipeline_mode = #tpu.pipeline_mode<synchronous>, transform_indices = @transform_10, window_bounds = array<i64: 1, 128>}, {pipeline_mode = #tpu.pipeline_mode<synchronous>, transform_indices = @transform_11, window_bounds = array<i64: 1, 128>}, {transform_indices = @transform_12, window_bounds = array<i64: 1, 8, 128>}]} {
    %c0 = arith.constant 0 : index
    %c0_0 = arith.constant 0 : index
    %c0_1 = arith.constant 0 : index
    %0 = vector.load %arg1[%c0, %c0_0, %c0_1] : memref<1x8x128xf32, #tpu.memory_space<vmem>>, vector<1x8x128xf32>
    %1 = vector.shape_cast %0 : vector<1x8x128xf32> to vector<8x128xf32>
    %2 = tpu.iota {dimensions = array<i32: 1>} : vector<1x128xi32>
    %c32_i32 = arith.constant 32 : i32
    %3 = vector.broadcast %c32_i32 : i32 to vector<1x128xi32>
    %4 = arith.cmpi slt, %2, %3 : vector<1x128xi32>
    %5 = arith.extui %4 : vector<1x128xi1> to vector<1x128xi32>
    %6 = arith.sitofp %5 : vector<1x128xi32> to vector<1x128xf32>
    %c0_2 = arith.constant 0 : index
    %c0_3 = arith.constant 0 : index
    %7 = vector.load %arg2[%c0_2, %c0_3] : memref<1x128xf32, #tpu.memory_space<vmem>>, vector<1x128xf32>
    %c0_4 = arith.constant 0 : index
    %c0_5 = arith.constant 0 : index
    %8 = vector.load %arg3[%c0_4, %c0_5] : memref<1x128xf32, #tpu.memory_space<vmem>>, vector<1x128xf32>
    %9 = vector.broadcast %6 : vector<1x128xf32> to vector<8x128xf32>
    %10 = arith.mulf %1, %9 : vector<8x128xf32>
    %cst = arith.constant dense<0.000000e+00> : vector<8xf32>
    %11 = vector.multi_reduction <add>, %10, %cst [1] : vector<8x128xf32> to vector<8xf32>
    %12 = vector.shape_cast %11 : vector<8xf32> to vector<8x1xf32>
    %cst_6 = arith.constant 3.125000e-02 : f32
    %13 = vector.broadcast %cst_6 : f32 to vector<8x1xf32>
    %14 = arith.mulf %12, %13 : vector<8x1xf32>
    %15 = vector.broadcast %14 : vector<8x1xf32> to vector<8x128xf32>
    %16 = arith.subf %1, %15 : vector<8x128xf32>
    %17 = arith.mulf %16, %16 : vector<8x128xf32>
    %18 = vector.broadcast %6 : vector<1x128xf32> to vector<8x128xf32>
    %19 = arith.mulf %17, %18 : vector<8x128xf32>
    %cst_7 = arith.constant dense<0.000000e+00> : vector<8xf32>
    %20 = vector.multi_reduction <add>, %19, %cst_7 [1] : vector<8x128xf32> to vector<8xf32>
    %21 = vector.shape_cast %20 : vector<8xf32> to vector<8x1xf32>
    %cst_8 = arith.constant 3.125000e-02 : f32
    %22 = vector.broadcast %cst_8 : f32 to vector<8x1xf32>
    %23 = arith.mulf %21, %22 : vector<8x1xf32>
    %cst_9 = arith.constant 9.99999974E-6 : f32
    %24 = vector.broadcast %cst_9 : f32 to vector<8x1xf32>
    %25 = arith.addf %23, %24 : vector<8x1xf32>
    %26 = math.rsqrt %25 : vector<8x1xf32>
    %27 = vector.broadcast %26 : vector<8x1xf32> to vector<8x128xf32>
    %28 = arith.mulf %16, %27 : vector<8x128xf32>
    %29 = vector.broadcast %7 : vector<1x128xf32> to vector<8x128xf32>
    %30 = arith.mulf %28, %29 : vector<8x128xf32>
    %31 = vector.broadcast %8 : vector<1x128xf32> to vector<8x128xf32>
    %32 = arith.addf %30, %31 : vector<8x128xf32>
    %33 = arith.truncf %32 : vector<8x128xf32> to vector<8x128xbf16>
    %c0_10 = arith.constant 0 : index
    %c0_11 = arith.constant 0 : index
    %34 = vector.load %arg4[%c0_10, %c0_11] : memref<128x384xbf16, #tpu.memory_space<vmem>>, vector<128x384xbf16>
    %cst_12 = arith.constant dense<0.000000e+00> : vector<8x384xf32>
    %35 = tpu.matmul %33, %34, %cst_12 {dimension_numbers = #tpu.dot_dimension_numbers<[1], [0], [0], [1], [0, 0, 1, 1], [], []>} : vector<8x128xbf16>, vector<128x384xbf16>, vector<8x384xf32> -> vector<8x384xf32>
    %36 = vector.extract_strided_slice %35 {offsets = [0, 0], sizes = [8, 128], strides = [1, 1]} : vector<8x384xf32> to vector<8x128xf32>
    %cst_13 = arith.constant 0.176776692 : f32
    %37 = vector.broadcast %cst_13 : f32 to vector<8x128xf32>
    %38 = arith.mulf %36, %37 : vector<8x128xf32>
    %39 = arith.truncf %38 : vector<8x128xf32> to vector<8x128xbf16>
    %40 = vector.shape_cast %39 : vector<8x128xbf16> to vector<1x8x128xbf16>
    %41 = vector.extract_strided_slice %35 {offsets = [0, 128], sizes = [8, 128], strides = [1, 1]} : vector<8x384xf32> to vector<8x128xf32>
    %42 = arith.truncf %41 : vector<8x128xf32> to vector<8x128xbf16>
    %43 = vector.shape_cast %42 : vector<8x128xbf16> to vector<1x8x128xbf16>
    %44 = vector.extract_strided_slice %35 {offsets = [0, 256], sizes = [8, 128], strides = [1, 1]} : vector<8x384xf32> to vector<8x128xf32>
    %45 = arith.truncf %44 : vector<8x128xf32> to vector<8x128xbf16>
    %46 = vector.shape_cast %45 : vector<8x128xbf16> to vector<1x8x128xbf16>
    "tpu.trace_start"() <{level = 10 : i32, message = "bqd,bkd->bqk"}> : () -> ()
    %cst_14 = arith.constant dense<0.000000e+00> : vector<1x8x8xf32>
    %47 = tpu.matmul %40, %43, %cst_14 {dimension_numbers = #tpu.dot_dimension_numbers<[2], [2], [1], [1], [0, 0, 0, 1, 1, 1], [0], [0]>} : vector<1x8x128xbf16>, vector<1x8x128xbf16>, vector<1x8x8xf32> -> vector<1x8x8xf32>
    "tpu.trace_stop"() : () -> ()
    %cst_15 = arith.constant dense<0xFF800000> : vector<1x8xf32>
    %48 = vector.multi_reduction <maximumf>, %47, %cst_15 [2] : vector<1x8x8xf32> to vector<1x8xf32>
    %49 = vector.shape_cast %48 : vector<1x8xf32> to vector<1x8x1xf32>
    %50 = vector.broadcast %49 : vector<1x8x1xf32> to vector<1x8x8xf32>
    %51 = arith.subf %47, %50 : vector<1x8x8xf32>
    %52 = math.exp %51 : vector<1x8x8xf32>
    %cst_16 = arith.constant dense<0.000000e+00> : vector<1x8xf32>
    %53 = vector.multi_reduction <add>, %52, %cst_16 [2] : vector<1x8x8xf32> to vector<1x8xf32>
    %54 = vector.shape_cast %53 : vector<1x8xf32> to vector<1x8x1xf32>
    %55 = tpu.reciprocal %54 : vector<1x8x1xf32> -> vector<1x8x1xf32>
    %56 = vector.broadcast %55 : vector<1x8x1xf32> to vector<1x8x8xf32>
    %57 = arith.mulf %52, %56 : vector<1x8x8xf32>
    %58 = arith.truncf %57 : vector<1x8x8xf32> to vector<1x8x8xbf16>
    "tpu.trace_start"() <{level = 10 : i32, message = "bqk,bkd->bqd"}> : () -> ()
    %cst_17 = arith.constant dense<0.000000e+00> : vector<1x8x128xf32>
    %59 = tpu.matmul %58, %46, %cst_17 {dimension_numbers = #tpu.dot_dimension_numbers<[2], [1], [1], [2], [0, 0, 0, 1, 1, 2], [0], [0]>} : vector<1x8x8xbf16>, vector<1x8x128xbf16>, vector<1x8x128xf32> -> vector<1x8x128xf32>
    "tpu.trace_stop"() : () -> ()
    %60 = vector.shape_cast %59 : vector<1x8x128xf32> to vector<8x128xf32>
    %61 = arith.truncf %60 : vector<8x128xf32> to vector<8x128xbf16>
    %c0_18 = arith.constant 0 : index
    %c0_19 = arith.constant 0 : index
    %62 = vector.load %arg5[%c0_18, %c0_19] : memref<128x128xbf16, #tpu.memory_space<vmem>>, vector<128x128xbf16>
    %cst_20 = arith.constant dense<0.000000e+00> : vector<8x128xf32>
    %63 = tpu.matmul %61, %62, %cst_20 {dimension_numbers = #tpu.dot_dimension_numbers<[1], [0], [0], [1], [0, 0, 1, 1], [], []>} : vector<8x128xbf16>, vector<128x128xbf16>, vector<8x128xf32> -> vector<8x128xf32>
    %c0_21 = arith.constant 0 : index
    %c0_22 = arith.constant 0 : index
    %64 = vector.load %arg6[%c0_21, %c0_22] : memref<1x128xf32, #tpu.memory_space<vmem>>, vector<1x128xf32>
    %65 = vector.broadcast %64 : vector<1x128xf32> to vector<8x128xf32>
    %66 = arith.addf %63, %65 : vector<8x128xf32>
    %67 = arith.addf %66, %1 : vector<8x128xf32>
    %c0_23 = arith.constant 0 : index
    %c0_24 = arith.constant 0 : index
    %68 = vector.load %arg11[%c0_23, %c0_24] : memref<1x128xf32, #tpu.memory_space<vmem>>, vector<1x128xf32>
    %c0_25 = arith.constant 0 : index
    %c0_26 = arith.constant 0 : index
    %69 = vector.load %arg12[%c0_25, %c0_26] : memref<1x128xf32, #tpu.memory_space<vmem>>, vector<1x128xf32>
    %70 = vector.broadcast %6 : vector<1x128xf32> to vector<8x128xf32>
    %71 = arith.mulf %67, %70 : vector<8x128xf32>
    %cst_27 = arith.constant dense<0.000000e+00> : vector<8xf32>
    %72 = vector.multi_reduction <add>, %71, %cst_27 [1] : vector<8x128xf32> to vector<8xf32>
    %73 = vector.shape_cast %72 : vector<8xf32> to vector<8x1xf32>
    %cst_28 = arith.constant 3.125000e-02 : f32
    %74 = vector.broadcast %cst_28 : f32 to vector<8x1xf32>
    %75 = arith.mulf %73, %74 : vector<8x1xf32>
    %76 = vector.broadcast %75 : vector<8x1xf32> to vector<8x128xf32>
    %77 = arith.subf %67, %76 : vector<8x128xf32>
    %78 = arith.mulf %77, %77 : vector<8x128xf32>
    %79 = vector.broadcast %6 : vector<1x128xf32> to vector<8x128xf32>
    %80 = arith.mulf %78, %79 : vector<8x128xf32>
    %cst_29 = arith.constant dense<0.000000e+00> : vector<8xf32>
    %81 = vector.multi_reduction <add>, %80, %cst_29 [1] : vector<8x128xf32> to vector<8xf32>
    %82 = vector.shape_cast %81 : vector<8xf32> to vector<8x1xf32>
    %cst_30 = arith.constant 3.125000e-02 : f32
    %83 = vector.broadcast %cst_30 : f32 to vector<8x1xf32>
    %84 = arith.mulf %82, %83 : vector<8x1xf32>
    %cst_31 = arith.constant 9.99999974E-6 : f32
    %85 = vector.broadcast %cst_31 : f32 to vector<8x1xf32>
    %86 = arith.addf %84, %85 : vector<8x1xf32>
    %87 = math.rsqrt %86 : vector<8x1xf32>
    %88 = vector.broadcast %87 : vector<8x1xf32> to vector<8x128xf32>
    %89 = arith.mulf %77, %88 : vector<8x128xf32>
    %90 = vector.broadcast %68 : vector<1x128xf32> to vector<8x128xf32>
    %91 = arith.mulf %89, %90 : vector<8x128xf32>
    %92 = vector.broadcast %69 : vector<1x128xf32> to vector<8x128xf32>
    %93 = arith.addf %91, %92 : vector<8x128xf32>
    %94 = arith.truncf %93 : vector<8x128xf32> to vector<8x128xbf16>
    %c0_32 = arith.constant 0 : index
    %c0_33 = arith.constant 0 : index
    %95 = vector.load %arg7[%c0_32, %c0_33] : memref<128x128xbf16, #tpu.memory_space<vmem>>, vector<128x128xbf16>
    %cst_34 = arith.constant dense<0.000000e+00> : vector<8x128xf32>
    %96 = tpu.matmul %94, %95, %cst_34 {dimension_numbers = #tpu.dot_dimension_numbers<[1], [0], [0], [1], [0, 0, 1, 1], [], []>} : vector<8x128xbf16>, vector<128x128xbf16>, vector<8x128xf32> -> vector<8x128xf32>
    %c0_35 = arith.constant 0 : index
    %c0_36 = arith.constant 0 : index
    %97 = vector.load %arg8[%c0_35, %c0_36] : memref<1x128xf32, #tpu.memory_space<vmem>>, vector<1x128xf32>
    %98 = vector.broadcast %97 : vector<1x128xf32> to vector<8x128xf32>
    %99 = arith.addf %96, %98 : vector<8x128xf32>
    %cst_37 = arith.constant 5.000000e-01 : f32
    %100 = vector.broadcast %cst_37 : f32 to vector<8x128xf32>
    %101 = arith.mulf %100, %99 : vector<8x128xf32>
    %cst_38 = arith.constant 0.707106769 : f32
    %102 = vector.broadcast %cst_38 : f32 to vector<8x128xf32>
    %103 = arith.mulf %99, %102 : vector<8x128xf32>
    %104 = math.erf %103 : vector<8x128xf32>
    %cst_39 = arith.constant 1.000000e+00 : f32
    %105 = vector.broadcast %cst_39 : f32 to vector<8x128xf32>
    %106 = arith.addf %105, %104 : vector<8x128xf32>
    %107 = arith.mulf %101, %106 : vector<8x128xf32>
    %108 = arith.truncf %107 : vector<8x128xf32> to vector<8x128xbf16>
    %c0_40 = arith.constant 0 : index
    %c0_41 = arith.constant 0 : index
    %109 = vector.load %arg9[%c0_40, %c0_41] : memref<128x128xbf16, #tpu.memory_space<vmem>>, vector<128x128xbf16>
    %cst_42 = arith.constant dense<0.000000e+00> : vector<8x128xf32>
    %110 = tpu.matmul %108, %109, %cst_42 {dimension_numbers = #tpu.dot_dimension_numbers<[1], [0], [0], [1], [0, 0, 1, 1], [], []>} : vector<8x128xbf16>, vector<128x128xbf16>, vector<8x128xf32> -> vector<8x128xf32>
    %c0_43 = arith.constant 0 : index
    %c0_44 = arith.constant 0 : index
    %111 = vector.load %arg10[%c0_43, %c0_44] : memref<1x128xf32, #tpu.memory_space<vmem>>, vector<1x128xf32>
    %112 = vector.broadcast %111 : vector<1x128xf32> to vector<8x128xf32>
    %113 = arith.addf %110, %112 : vector<8x128xf32>
    %114 = arith.addf %93, %113 : vector<8x128xf32>
    %115 = vector.shape_cast %114 : vector<8x128xf32> to vector<1x8x128xf32>
    %c0_45 = arith.constant 0 : index
    %c0_46 = arith.constant 0 : index
    %c0_47 = arith.constant 0 : index
    %116 = vector.load %arg13[%c0_45, %c0_46, %c0_47] : memref<1x8x128xf32, #tpu.memory_space<vmem>>, vector<1x8x128xf32>
    tpu.vector_store %arg13[%c0_45, %c0_46, %c0_47], %115 {strides = array<i32>} : memref<1x8x128xf32, #tpu.memory_space<vmem>>, vector<1x8x128xf32>,
    return
  }
  func.func @transform_0(%arg0: i32) -> (i32, i32, i32) {
    %c0_i32 = arith.constant 0 : i32
    %c0_i32_0 = arith.constant 0 : i32
    %c0_i32_1 = arith.constant 0 : i32
    return %arg0, %c0_i32, %c0_i32_0 : i32, i32, i32
  }
  func.func @transform_1(%arg0: i32) -> (i32, i32) {
    %c0_i32 = arith.constant 0 : i32
    %c0_i32_0 = arith.constant 0 : i32
    %c0_i32_1 = arith.constant 0 : i32
    return %c0_i32, %c0_i32_0 : i32, i32
  }
  func.func @transform_2(%arg0: i32) -> (i32, i32) {
    %c0_i32 = arith.constant 0 : i32
    %c0_i32_0 = arith.constant 0 : i32
    %c0_i32_1 = arith.constant 0 : i32
    return %c0_i32, %c0_i32_0 : i32, i32
  }
  func.func @transform_3(%arg0: i32) -> (i32, i32) {
    %c0_i32 = arith.constant 0 : i32
    %c0_i32_0 = arith.constant 0 : i32
    %c0_i32_1 = arith.constant 0 : i32
    return %c0_i32, %c0_i32_0 : i32, i32
  }
  func.func @transform_4(%arg0: i32) -> (i32, i32) {
    %c0_i32 = arith.constant 0 : i32
    %c0_i32_0 = arith.constant 0 : i32
    %c0_i32_1 = arith.constant 0 : i32
    return %c0_i32, %c0_i32_0 : i32, i32
  }
  func.func @transform_5(%arg0: i32) -> (i32, i32) {
    %c0_i32 = arith.constant 0 : i32
    %c0_i32_0 = arith.constant 0 : i32
    %c0_i32_1 = arith.constant 0 : i32
    return %c0_i32, %c0_i32_0 : i32, i32
  }
  func.func @transform_6(%arg0: i32) -> (i32, i32) {
    %c0_i32 = arith.constant 0 : i32
    %c0_i32_0 = arith.constant 0 : i32
    %c0_i32_1 = arith.constant 0 : i32
    return %c0_i32, %c0_i32_0 : i32, i32
  }
  func.func @transform_7(%arg0: i32) -> (i32, i32) {
    %c0_i32 = arith.constant 0 : i32
    %c0_i32_0 = arith.constant 0 : i32
    %c0_i32_1 = arith.constant 0 : i32
    return %c0_i32, %c0_i32_0 : i32, i32
  }
  func.func @transform_8(%arg0: i32) -> (i32, i32) {
    %c0_i32 = arith.constant 0 : i32
    %c0_i32_0 = arith.constant 0 : i32
    %c0_i32_1 = arith.constant 0 : i32
    return %c0_i32, %c0_i32_0 : i32, i32
  }
  func.func @transform_9(%arg0: i32) -> (i32, i32) {
    %c0_i32 = arith.constant 0 : i32
    %c0_i32_0 = arith.constant 0 : i32
    %c0_i32_1 = arith.constant 0 : i32
    return %c0_i32, %c0_i32_0 : i32, i32
  }
  func.func @transform_10(%arg0: i32) -> (i32, i32) {
    %c0_i32 = arith.constant 0 : i32
    %c0_i32_0 = arith.constant 0 : i32
    %c0_i32_1 = arith.constant 0 : i32
    return %c0_i32, %c0_i32_0 : i32, i32
  }
  func.func @transform_11(%arg0: i32) -> (i32, i32) {
    %c0_i32 = arith.constant 0 : i32
    %c0_i32_0 = arith.constant 0 : i32
    %c0_i32_1 = arith.constant 0 : i32
    return %c0_i32, %c0_i32_0 : i32, i32
  }
  func.func @transform_12(%arg0: i32) -> (i32, i32, i32) {
    %c0_i32 = arith.constant 0 : i32
    %c0_i32_0 = arith.constant 0 : i32
    %c0_i32_1 = arith.constant 0 : i32
    return %arg0, %c0_i32, %c0_i32_0 : i32, i32, i32
  }
}

module attributes {stable_mosaic.version = 11 : i64} {
  func.func @encoder_kernel(%arg0: i32, %arg1: memref<1x8x128xf32, #tpu.memory_space<vmem>>, %arg2: memref<1x128xf32, #tpu.memory_space<vmem>>, %arg3: memref<1x128xf32, #tpu.memory_space<vmem>>, %arg4: memref<128x384xbf16, #tpu.memory_space<vmem>>, %arg5: memref<128x128xbf16, #tpu.memory_space<vmem>>, %arg6: memref<1x128xf32, #tpu.memory_space<vmem>>, %arg7: memref<128x128xbf16, #tpu.memory_space<vmem>>, %arg8: memref<1x128xf32, #tpu.memory_space<vmem>>, %arg9: memref<128x128xbf16, #tpu.memory_space<vmem>>, %arg10: memref<1x128xf32, #tpu.memory_space<vmem>>, %arg11: memref<1x128xf32, #tpu.memory_space<vmem>>, %arg12: memref<1x128xf32, #tpu.memory_space<vmem>>, %arg13: memref<1x8x128xf32, #tpu.memory_space<vmem>>) attributes {dimension_semantics = [#tpu.dimension_semantics<parallel>], iteration_bounds = array<i64: 2>, scalar_prefetch = 0 : i64, scratch_operands = 0 : i64, tpu.core_type = #tpu.core_type<tc>, window_params = [{transform_indices = @transform_0, window_bounds = array<i64: 1, 8, 128>}, {pipeline_mode = #tpu.pipeline_mode<synchronous>, transform_indices = @transform_1, window_bounds = array<i64: 1, 128>}, {pipeline_mode = #tpu.pipeline_mode<synchronous>, transform_indices = @transform_2, window_bounds = array<i64: 1, 128>}, {pipeline_mode = #tpu.pipeline_mode<synchronous>, transform_indices = @transform_3, window_bounds = array<i64: 128, 384>}, {pipeline_mode = #tpu.pipeline_mode<synchronous>, transform_indices = @transform_4, window_bounds = array<i64: 128, 128>}, {pipeline_mode = #tpu.pipeline_mode<synchronous>, transform_indices = @transform_5, window_bounds = array<i64: 1, 128>}, {pipeline_mode = #tpu.pipeline_mode<synchronous>, transform_indices = @transform_6, window_bounds = array<i64: 128, 128>}, {pipeline_mode = #tpu.pipeline_mode<synchronous>, transform_indices = @transform_7, window_bounds = array<i64: 1, 128>}, {pipeline_mode = #tpu.pipeline_mode<synchronous>, transform_indices = @transform_8, window_bounds = array<i64: 128, 128>}, {pipeline_mode = #tpu.pipeline_mode<synchronous>, transform_indices = @transform_9, window_bounds = array<i64: 1, 128>}, {pipeline_mode = #tpu.pipeline_mode<synchronous>, transform_indices = @transform_10, window_bounds = array<i64: 1, 128>}, {pipeline_mode = #tpu.pipeline_mode<synchronous>, transform_indices = @transform_11, window_bounds = array<i64: 1, 128>}, {transform_indices = @transform_12, window_bounds = array<i64: 1, 8, 128>}]} {
    %c0 = arith.constant 0 : index
    %c0_0 = arith.constant 0 : index
    %c0_1 = arith.constant 0 : index
    %0 = vector.load %arg1[%c0, %c0_0, %c0_1] : memref<1x8x128xf32, #tpu.memory_space<vmem>>, vector<1x8x128xf32>
    %1 = vector.shape_cast %0 : vector<1x8x128xf32> to vector<8x128xf32>
    %2 = tpu.iota {dimensions = array<i32: 1>} : vector<1x128xi32>
    %c32_i32 = arith.constant 32 : i32
    %3 = vector.broadcast %c32_i32 : i32 to vector<1x128xi32>
    %4 = arith.cmpi slt, %2, %3 : vector<1x128xi32>
    %5 = arith.extui %4 : vector<1x128xi1> to vector<1x128xi32>
    %6 = arith.sitofp %5 : vector<1x128xi32> to vector<1x128xf32>
    %c0_2 = arith.constant 0 : index
    %c0_3 = arith.constant 0 : index
    %7 = vector.load %arg2[%c0_2, %c0_3] : memref<1x128xf32, #tpu.memory_space<vmem>>, vector<1x128xf32>
    %c0_4 = arith.constant 0 : index
    %c0_5 = arith.constant 0 : index
    %8 = vector.load %arg3[%c0_4, %c0_5] : memref<1x128xf32, #tpu.memory_space<vmem>>, vector<1x128xf32>
    %9 = vector.broadcast %6 : vector<1x128xf32> to vector<8x128xf32>
    %10 = arith.mulf %1, %9 : vector<8x128xf32>
    %cst = arith.constant dense<0.000000e+00> : vector<8xf32>
    %11 = vector.multi_reduction <add>, %10, %cst [1] : vector<8x128xf32> to vector<8xf32>
    %12 = vector.shape_cast %11 : vector<8xf32> to vector<8x1xf32>
    %cst_6 = arith.constant 3.125000e-02 : f32
    %13 = vector.broadcast %cst_6 : f32 to vector<8x1xf32>
    %14 = arith.mulf %12, %13 : vector<8x1xf32>
    %15 = vector.broadcast %14 : vector<8x1xf32> to vector<8x128xf32>
    %16 = arith.subf %1, %15 : vector<8x128xf32>
    %17 = arith.mulf %16, %16 : vector<8x128xf32>
    %18 = vector.broadcast %6 : vector<1x128xf32> to vector<8x128xf32>
    %19 = arith.mulf %17, %18 : vector<8x128xf32>
    %cst_7 = arith.constant dense<0.000000e+00> : vector<8xf32>
    %20 = vector.multi_reduction <add>, %19, %cst_7 [1] : vector<8x128xf32> to vector<8xf32>
    %21 = vector.shape_cast %20 : vector<8xf32> to vector<8x1xf32>
    %cst_8 = arith.constant 3.125000e-02 : f32
    %22 = vector.broadcast %cst_8 : f32 to vector<8x1xf32>
    %23 = arith.mulf %21, %22 : vector<8x1xf32>
    %cst_9 = arith.constant 9.99999974E-6 : f32
    %24 = vector.broadcast %cst_9 : f32 to vector<8x1xf32>
    %25 = arith.addf %23, %24 : vector<8x1xf32>
    %26 = math.rsqrt %25 : vector<8x1xf32>
    %27 = vector.broadcast %26 : vector<8x1xf32> to vector<8x128xf32>
    %28 = arith.mulf %16, %27 : vector<8x128xf32>
    %29 = vector.broadcast %7 : vector<1x128xf32> to vector<8x128xf32>
    %30 = arith.mulf %28, %29 : vector<8x128xf32>
    %31 = vector.broadcast %8 : vector<1x128xf32> to vector<8x128xf32>
    %32 = arith.addf %30, %31 : vector<8x128xf32>
    %33 = arith.truncf %32 : vector<8x128xf32> to vector<8x128xbf16>
    %c0_10 = arith.constant 0 : index
    %c0_11 = arith.constant 0 : index
    %34 = vector.load %arg4[%c0_10, %c0_11] : memref<128x384xbf16, #tpu.memory_space<vmem>>, vector<128x384xbf16>
    %cst_12 = arith.constant dense<0.000000e+00> : vector<8x384xf32>
    %35 = tpu.matmul %33, %34, %cst_12 {dimension_numbers = #tpu.dot_dimension_numbers<[1], [0], [0], [1], [0, 0, 1, 1], [], []>} : vector<8x128xbf16>, vector<128x384xbf16>, vector<8x384xf32> -> vector<8x384xf32>
    %36 = vector.extract_strided_slice %35 {offsets = [0, 0], sizes = [8, 128], strides = [1, 1]} : vector<8x384xf32> to vector<8x128xf32>
    %cst_13 = arith.constant 0.176776692 : f32
    %37 = vector.broadcast %cst_13 : f32 to vector<8x128xf32>
    %38 = arith.mulf %36, %37 : vector<8x128xf32>
    %39 = arith.truncf %38 : vector<8x128xf32> to vector<8x128xbf16>
    %40 = vector.shape_cast %39 : vector<8x128xbf16> to vector<1x8x128xbf16>
    %41 = vector.extract_strided_slice %35 {offsets = [0, 128], sizes = [8, 128], strides = [1, 1]} : vector<8x384xf32> to vector<8x128xf32>
    %42 = arith.truncf %41 : vector<8x128xf32> to vector<8x128xbf16>
    %43 = vector.shape_cast %42 : vector<8x128xbf16> to vector<1x8x128xbf16>
    %44 = vector.extract_strided_slice %35 {offsets = [0, 256], sizes = [8, 128], strides = [1, 1]} : vector<8x384xf32> to vector<8x128xf32>
    %45 = arith.truncf %44 : vector<8x128xf32> to vector<8x128xbf16>
    %46 = vector.shape_cast %45 : vector<8x128xbf16> to vector<1x8x128xbf16>
    "tpu.trace_start"() <{level = 10 : i32, message = "bqd,bkd->bqk"}> : () -> ()
    %cst_14 = arith.constant dense<0.000000e+00> : vector<1x8x8xf32>
    %47 = tpu.matmul %40, %43, %cst_14 {dimension_numbers = #tpu.dot_dimension_numbers<[2], [2], [1], [1], [0, 0, 0, 1, 1, 1], [0], [0]>} : vector<1x8x128xbf16>, vector<1x8x128xbf16>, vector<1x8x8xf32> -> vector<1x8x8xf32>
    "tpu.trace_stop"() : () -> ()
    %cst_15 = arith.constant dense<0xFF800000> : vector<1x8xf32>
    %48 = vector.multi_reduction <maximumf>, %47, %cst_15 [2] : vector<1x8x8xf32> to vector<1x8xf32>
    %49 = vector.shape_cast %48 : vector<1x8xf32> to vector<1x8x1xf32>
    %50 = vector.broadcast %49 : vector<1x8x1xf32> to vector<1x8x8xf32>
    %51 = arith.subf %47, %50 : vector<1x8x8xf32>
    %52 = math.exp %51 : vector<1x8x8xf32>
    %cst_16 = arith.constant dense<0.000000e+00> : vector<1x8xf32>
    %53 = vector.multi_reduction <add>, %52, %cst_16 [2] : vector<1x8x8xf32> to vector<1x8xf32>
    %54 = vector.shape_cast %53 : vector<1x8xf32> to vector<1x8x1xf32>
    %55 = tpu.reciprocal %54 : vector<1x8x1xf32> -> vector<1x8x1xf32>
    %56 = vector.broadcast %55 : vector<1x8x1xf32> to vector<1x8x8xf32>
    %57 = arith.mulf %52, %56 : vector<1x8x8xf32>
    %58 = arith.truncf %57 : vector<1x8x8xf32> to vector<1x8x8xbf16>
    "tpu.trace_start"() <{level = 10 : i32, message = "bqk,bkd->bqd"}> : () -> ()
    %cst_17 = arith.constant dense<0.000000e+00> : vector<1x8x128xf32>
    %59 = tpu.matmul %58, %46, %cst_17 {dimension_numbers = #tpu.dot_dimension_numbers<[2], [1], [1], [2], [0, 0, 0, 1, 1, 2], [0], [0]>} : vector<1x8x8xbf16>, vector<1x8x128xbf16>, vector<1x8x128xf32> -> vector<1x8x128xf32>
    "tpu.trace_stop"() : () -> ()
    %60 = vector.shape_cast %59 : vector<1x8x128xf32> to vector<8x128xf32>
    %61 = arith.truncf %60 : vector<8x128xf32> to vector<8x128xbf16>
    %c0_18 = arith.constant 0 : index
    %c0_19 = arith.constant 0 : index
    %62 = vector.load %arg5[%c0_18, %c0_19] : memref<128x128xbf16, #tpu.memory_space<vmem>>, vector<128x128xbf16>
    %cst_20 = arith.constant dense<0.000000e+00> : vector<8x128xf32>
    %63 = tpu.matmul %61, %62, %cst_20 {dimension_numbers = #tpu.dot_dimension_numbers<[1], [0], [0], [1], [0, 0, 1, 1], [], []>} : vector<8x128xbf16>, vector<128x128xbf16>, vector<8x128xf32> -> vector<8x128xf32>
    %c0_21 = arith.constant 0 : index
    %c0_22 = arith.constant 0 : index
    %64 = vector.load %arg6[%c0_21, %c0_22] : memref<1x128xf32, #tpu.memory_space<vmem>>, vector<1x128xf32>
    %65 = vector.broadcast %64 : vector<1x128xf32> to vector<8x128xf32>
    %66 = arith.addf %63, %65 : vector<8x128xf32>
    %67 = arith.addf %66, %1 : vector<8x128xf32>
    %c0_23 = arith.constant 0 : index
    %c0_24 = arith.constant 0 : index
    %68 = vector.load %arg11[%c0_23, %c0_24] : memref<1x128xf32, #tpu.memory_space<vmem>>, vector<1x128xf32>
    %c0_25 = arith.constant 0 : index
    %c0_26 = arith.constant 0 : index
    %69 = vector.load %arg12[%c0_25, %c0_26] : memref<1x128xf32, #tpu.memory_space<vmem>>, vector<1x128xf32>
    %70 = vector.broadcast %6 : vector<1x128xf32> to vector<8x128xf32>
    %71 = arith.mulf %67, %70 : vector<8x128xf32>
    %cst_27 = arith.constant dense<0.000000e+00> : vector<8xf32>
    %72 = vector.multi_reduction <add>, %71, %cst_27 [1] : vector<8x128xf32> to vector<8xf32>
    %73 = vector.shape_cast %72 : vector<8xf32> to vector<8x1xf32>
    %cst_28 = arith.constant 3.125000e-02 : f32
    %74 = vector.broadcast %cst_28 : f32 to vector<8x1xf32>
    %75 = arith.mulf %73, %74 : vector<8x1xf32>
    %76 = vector.broadcast %75 : vector<8x1xf32> to vector<8x128xf32>
    %77 = arith.subf %67, %76 : vector<8x128xf32>
    %78 = arith.mulf %77, %77 : vector<8x128xf32>
    %79 = vector.broadcast %6 : vector<1x128xf32> to vector<8x128xf32>
    %80 = arith.mulf %78, %79 : vector<8x128xf32>
    %cst_29 = arith.constant dense<0.000000e+00> : vector<8xf32>
    %81 = vector.multi_reduction <add>, %80, %cst_29 [1] : vector<8x128xf32> to vector<8xf32>
    %82 = vector.shape_cast %81 : vector<8xf32> to vector<8x1xf32>
    %cst_30 = arith.constant 3.125000e-02 : f32
    %83 = vector.broadcast %cst_30 : f32 to vector<8x1xf32>
    %84 = arith.mulf %82, %83 : vector<8x1xf32>
    %cst_31 = arith.constant 9.99999974E-6 : f32
    %85 = vector.broadcast %cst_31 : f32 to vector<8x1xf32>
    %86 = arith.addf %84, %85 : vector<8x1xf32>
    %87 = math.rsqrt %86 : vector<8x1xf32>
    %88 = vector.broadcast %87 : vector<8x1xf32> to vector<8x128xf32>
    %89 = arith.mulf %77, %88 : vector<8x128xf32>
    %90 = vector.broadcast %68 : vector<1x128xf32> to vector<8x128xf32>
    %91 = arith.mulf %89, %90 : vector<8x128xf32>
    %92 = vector.broadcast %69 : vector<1x128xf32> to vector<8x128xf32>
    %93 = arith.addf %91, %92 : vector<8x128xf32>
    %94 = arith.truncf %93 : vector<8x128xf32> to vector<8x128xbf16>
    %c0_32 = arith.constant 0 : index
    %c0_33 = arith.constant 0 : index
    %95 = vector.load %arg7[%c0_32, %c0_33] : memref<128x128xbf16, #tpu.memory_space<vmem>>, vector<128x128xbf16>
    %cst_34 = arith.constant dense<0.000000e+00> : vector<8x128xf32>
    %96 = tpu.matmul %94, %95, %cst_34 {dimension_numbers = #tpu.dot_dimension_numbers<[1], [0], [0], [1], [0, 0, 1, 1], [], []>} : vector<8x128xbf16>, vector<128x128xbf16>, vector<8x128xf32> -> vector<8x128xf32>
    %c0_35 = arith.constant 0 : index
    %c0_36 = arith.constant 0 : index
    %97 = vector.load %arg8[%c0_35, %c0_36] : memref<1x128xf32, #tpu.memory_space<vmem>>, vector<1x128xf32>
    %98 = vector.broadcast %97 : vector<1x128xf32> to vector<8x128xf32>
    %99 = arith.addf %96, %98 : vector<8x128xf32>
    %cst_37 = arith.constant 5.000000e-01 : f32
    %100 = vector.broadcast %cst_37 : f32 to vector<8x128xf32>
    %101 = arith.mulf %100, %99 : vector<8x128xf32>
    %cst_38 = arith.constant 0.707106769 : f32
    %102 = vector.broadcast %cst_38 : f32 to vector<8x128xf32>
    %103 = arith.mulf %99, %102 : vector<8x128xf32>
    %104 = math.erf %103 : vector<8x128xf32>
    %cst_39 = arith.constant 1.000000e+00 : f32
    %105 = vector.broadcast %cst_39 : f32 to vector<8x128xf32>
    %106 = arith.addf %105, %104 : vector<8x128xf32>
    %107 = arith.mulf %101, %106 : vector<8x128xf32>
    %108 = arith.truncf %107 : vector<8x128xf32> to vector<8x128xbf16>
    %c0_40 = arith.constant 0 : index
    %c0_41 = arith.constant 0 : index
    %109 = vector.load %arg9[%c0_40, %c0_41] : memref<128x128xbf16, #tpu.memory_space<vmem>>, vector<128x128xbf16>
    %cst_42 = arith.constant dense<0.000000e+00> : vector<8x128xf32>
    %110 = tpu.matmul %108, %109, %cst_42 {dimension_numbers = #tpu.dot_dimension_numbers<[1], [0], [0], [1], [0, 0, 1, 1], [], []>} : vector<8x128xbf16>, vector<128x128xbf16>, vector<8x128xf32> -> vector<8x128xf32>
    %c0_43 = arith.constant 0 : index
    %c0_44 = arith.constant 0 : index
    %111 = vector.load %arg10[%c0_43, %c0_44] : memref<1x128xf32, #tpu.memory_space<vmem>>, vector<1x128xf32>
    %112 = vector.broadcast %111 : vector<1x128xf32> to vector<8x128xf32>
    %113 = arith.addf %110, %112 : vector<8x128xf32>
    %114 = arith.addf %93, %113 : vector<8x128xf32>
    %115 = vector.shape_cast %114 : vector<8x128xf32> to vector<1x8x128xf32>
    %c0_45 = arith.constant 0 : index
    %c0_46 = arith.constant 0 : index
    %c0_47 = arith.constant 0 : index
    %116 = vector.load %arg13[%c0_45, %c0_46, %c0_47] : memref<1x8x128xf32, #tpu.memory_space<vmem>>, vector<1x8x128xf32>
    tpu.vector_store %arg13[%c0_45, %c0_46, %c0_47], %115 {strides = array<i32>} : memref<1x8x128xf32, #tpu.memory_space<vmem>>, vector<1x8x128xf32>,
    return
  }
  func.func @transform_0(%arg0: i32) -> (i32, i32, i32) {
    %c0_i32 = arith.constant 0 : i32
    %c0_i32_0 = arith.constant 0 : i32
    %c0_i32_1 = arith.constant 0 : i32
    return %arg0, %c0_i32, %c0_i32_0 : i32, i32, i32
  }
  func.func @transform_1(%arg0: i32) -> (i32, i32) {
    %c0_i32 = arith.constant 0 : i32
    %c0_i32_0 = arith.constant 0 : i32
    %c0_i32_1 = arith.constant 0 : i32
    return %c0_i32, %c0_i32_0 : i32, i32
  }
  func.func @transform_2(%arg0: i32) -> (i32, i32) {
    %c0_i32 = arith.constant 0 : i32
    %c0_i32_0 = arith.constant 0 : i32
    %c0_i32_1 = arith.constant 0 : i32
    return %c0_i32, %c0_i32_0 : i32, i32
  }
  func.func @transform_3(%arg0: i32) -> (i32, i32) {
    %c0_i32 = arith.constant 0 : i32
    %c0_i32_0 = arith.constant 0 : i32
    %c0_i32_1 = arith.constant 0 : i32
    return %c0_i32, %c0_i32_0 : i32, i32
  }
  func.func @transform_4(%arg0: i32) -> (i32, i32) {
    %c0_i32 = arith.constant 0 : i32
    %c0_i32_0 = arith.constant 0 : i32
    %c0_i32_1 = arith.constant 0 : i32
    return %c0_i32, %c0_i32_0 : i32, i32
  }
  func.func @transform_5(%arg0: i32) -> (i32, i32) {
    %c0_i32 = arith.constant 0 : i32
    %c0_i32_0 = arith.constant 0 : i32
    %c0_i32_1 = arith.constant 0 : i32
    return %c0_i32, %c0_i32_0 : i32, i32
  }
  func.func @transform_6(%arg0: i32) -> (i32, i32) {
    %c0_i32 = arith.constant 0 : i32
    %c0_i32_0 = arith.constant 0 : i32
    %c0_i32_1 = arith.constant 0 : i32
    return %c0_i32, %c0_i32_0 : i32, i32
  }
  func.func @transform_7(%arg0: i32) -> (i32, i32) {
    %c0_i32 = arith.constant 0 : i32
    %c0_i32_0 = arith.constant 0 : i32
    %c0_i32_1 = arith.constant 0 : i32
    return %c0_i32, %c0_i32_0 : i32, i32
  }
  func.func @transform_8(%arg0: i32) -> (i32, i32) {
    %c0_i32 = arith.constant 0 : i32
    %c0_i32_0 = arith.constant 0 : i32
    %c0_i32_1 = arith.constant 0 : i32
    return %c0_i32, %c0_i32_0 : i32, i32
  }
  func.func @transform_9(%arg0: i32) -> (i32, i32) {
    %c0_i32 = arith.constant 0 : i32
    %c0_i32_0 = arith.constant 0 : i32
    %c0_i32_1 = arith.constant 0 : i32
    return %c0_i32, %c0_i32_0 : i32, i32
  }
  func.func @transform_10(%arg0: i32) -> (i32, i32) {
    %c0_i32 = arith.constant 0 : i32
    %c0_i32_0 = arith.constant 0 : i32
    %c0_i32_1 = arith.constant 0 : i32
    return %c0_i32, %c0_i32_0 : i32, i32
  }
  func.func @transform_11(%arg0: i32) -> (i32, i32) {
    %c0_i32 = arith.constant 0 : i32
    %c0_i32_0 = arith.constant 0 : i32
    %c0_i32_1 = arith.constant 0 : i32
    return %c0_i32, %c0_i32_0 : i32, i32
  }
  func.func @transform_12(%arg0: i32) -> (i32, i32, i32) {
    %c0_i32 = arith.constant 0 : i32
    %c0_i32_0 = arith.constant 0 : i32
    %c0_i32_1 = arith.constant 0 : i32
    return %arg0, %c0_i32, %c0_i32_0 : i32, i32, i32
  }
}

</mosaic_0001>

<bundles_post_ra>
// kernel: tpu_custom_call.1
= control target key start
LH: loop header
LB: loop body
LE: loop exit
PB: predicated region body
PF: predicated region fallthrough
CT: control target
= control target key end

     0   :  { %s2208_s0 = inlined_call_operand.hbm [shape: f32[2,8,128], index: 0, kind: input, shape index: {}]   ;;  %s2209_s1 = inlined_call_operand.hbm [shape: f32[1,128], index: 1, kind: input, shape index: {}]   ;;  %s2210_s2 = inlined_call_operand.vmem [shape: f32[1,128], index: 2, kind: input, shape index: {}]   ;;  %s2211_s3 = inlined_call_operand.hbm [shape: bf16[128,384], index: 3, kind: input, shape index: {}]   ;;  %s2212_s4 = inlined_call_operand.hbm [shape: bf16[128,128], index: 4, kind: input, shape index: {}]   ;;  %s2213_s5 = inlined_call_operand.vmem [shape: f32[1,128], index: 5, kind: input, shape index: {}]   ;;  %s2214_s6 = inlined_call_operand.hbm [shape: bf16[128,128], index: 6, kind: input, shape index: {}]   ;;  %s2215_s7 = inlined_call_operand.vmem [shape: f32[1,128], index: 7, kind: input, shape index: {}]   ;;  %s2216_s8 = inlined_call_operand.hbm [shape: bf16[128,128], index: 8, kind: input, shape index: {}]   ;;  %s2217_s9 = inlined_call_operand.vmem [shape: f32[1,128], index: 9, kind: input, shape index: {}]   ;;  %s2218_s10 = inlined_call_operand.vmem [shape: f32[1,128], index: 10, kind: input, shape index: {}]   ;;  %s2219_s11 = inlined_call_operand.vmem [shape: f32[1,128], index: 11, kind: input, shape index: {}]   ;;  %s2220_s12 = inlined_call_operand.hbm [shape: f32[2,8,128], index: 12, kind: output, shape index: {}]  }
   0x1   :  { %2222 = sst [smem:[#allocation19_spill]] %s2209_s1 }
   0x2   :  { %2223 = sst [smem:[#allocation20_spill]] %s2211_s3 }
   0x3   :  { %2224 = sst [smem:[#allocation21_spill]] %s2212_s4 }
   0x4   :  { %2225 = sst [smem:[#allocation22_spill]] %s2214_s6 }
   0x5   :  { %2226 = sst [smem:[#allocation23_spill]] %s2216_s8 }
   0x6   :  { %2227 = sst [smem:[#allocation24_spill]] %s2220_s12 }
   0x7   :  { %17 = vsyncpa [#allocation3], 0 }
   0x8   :  { %19 = vsyncpa [#allocation3 + $0x1], 0 }
   0x9   :  { %20 = vsyncpa [#allocation6], 0 }
   0xa   :  { %21 = vsyncpa [#allocation9], 0 }
   0xb   :  { %22 = vsyncpa [#allocation12], 0 }
   0xc   :  { %23 = vsyncpa [#allocation4], 0 }
   0xd   :  { %25 = vsyncpa [#allocation4 + $0x1], 0  ;;  %s1992_s21 = smov 0   ;;  %s1994_s22 = smov 0  }
   0xe   :  { %s1996_s23 = smov 0   ;;  %s1998_s24 = smov 0  }
   0xf LB: > { %s2228_s1 = sld [smem:[#allocation19_spill]]  ;;  %s2016_s28 = sadd.s32 4294967295, %s1915_s24   ;;  %s1915_s24 = sphi %s1998_s24, %s2244_s24   ;;  %s1911_s23 = sphi %s1996_s23, %s2243_s23   ;;  %s1907_s22 = sphi %s1994_s22, %s2242_s22   ;;  %s1903_s21 = sphi %s1992_s21, %s2241_s21  }
  0x10   : > { %p1274_p0 = scmp.ge.s32.totalorder %s1915_s24, 1  ;;  %p52_p1 = scmp.eq.s32.totalorder %s2016_s28, 0 }
  0x11   : > { %p319_p2 = scmp.lt.s32.totalorder %s1915_s24, 3  ;;  %s1917_s30 = smov [#allocation5]  }
  0x12   : > { %s333_s13 = sshll.u32 %s1917_s30, 4  ;;  %s2230_s4 = sld [smem:[#allocation21_spill]]  ;;  %s334_s13 = int_to_ptr.vmem [resolvable:$true] %s333_s13 }
  0x13   : > { %p2021_p3 = pnand %p1274_p0, %p319_p2  ;;  %s1918_s18 = smov [#allocation8]  }
  0x14   : > { %s361_s19 = sshll.u32 %s1918_s18, 4  ;;  %s1919_s20 = smov 64   ;;  %s362_s19 = int_to_ptr.vmem [resolvable:$true] %s361_s19 }
  0x15   : > { %s331_s27 = sshll.u32 %s2228_s1, 4  ;;  %p1562_p5 = pneg %p2021_p3  ;;  %s332_s27 = int_to_ptr.hbm [resolvable:$true] %s331_s27 }
  0x16   : > { %s1920_s25 = smov 4   ;;  %s2232_s3 = sld [smem:[#allocation20_spill]] }
  0x17   : > { %p2033_p6 = pnand %p1562_p5, %p52_p1  ;;  %s1921_s15 = smov [#allocation7]  }
  0x18   : > { %s359_s16 = sshll.u32 %s2230_s4, 4  ;;  %s347_s1 = sshll.u32 %s1921_s15, 4  ;;  %s360_s16 = int_to_ptr.hbm [resolvable:$true] %s359_s16  ;;  %s348_s1 = int_to_ptr.vmem [resolvable:$true] %s347_s1 }
  0x19   : > { %1565 = dma.hbm_to_vmem [thread:$0]  (!%p2033_p6), %s332_s27, 16, %s334_s13, [#allocation6]  }
  0x1a   : > { %1571 = dma.hbm_to_vmem [thread:$0]  (!%p2033_p6), %s360_s16, 1024, %s362_s19, [#allocation9], %s1919_s20, %s1919_s20, %s1920_s25  }
  0x1b   : > { %s2233_s6 = sld [smem:[#allocation22_spill]]  ;;  %s1922_s27 = smov 192  }
  0x1c   : > { %s345_s14 = sshll.u32 %s2232_s3, 4  ;;  %s1923_s13 = smov 12   ;;  %s346_s14 = int_to_ptr.hbm [resolvable:$true] %s345_s14 }
  0x1d   : > { %1568 = dma.hbm_to_vmem [thread:$0]  (!%p2033_p6), %s346_s14, 3072, %s348_s1, [#allocation6], %s1922_s27, %s1922_s27, %s1923_s13  }
  0x1e   : > { %s1924_s16 = smov [#allocation10]   ;;  %s2234_s8 = sld [smem:[#allocation23_spill]] }
  0x1f   : > { %s378_s19 = sshll.u32 %s1924_s16, 4  ;;  %s1925_s1 = smov [#allocation11]   ;;  %s379_s19 = int_to_ptr.vmem [resolvable:$true] %s378_s19 }
  0x20   : > { %s395_s12 = sshll.u32 %s1925_s1, 4  ;;  %s1273_s14 = sadd.s32 4294967294, %s1915_s24   ;;  %s396_s12 = int_to_ptr.vmem [resolvable:$true] %s395_s12 }
  0x21   : > { %s376_s18 = sshll.u32 %s2233_s6, 4  ;;  %s2058_s15 = sadd.s32 1, %s1915_s24   ;;  %s377_s18 = int_to_ptr.hbm [resolvable:$true] %s376_s18 }
  0x22   : > { %1574 = dma.hbm_to_vmem [thread:$0]  (!%p2033_p6), %s377_s18, 1024, %s379_s19, [#allocation9], %s1919_s20, %s1919_s20, %s1920_s25  }
  0x23   : > { %s38_s27 = sadd.s32 1, %s1911_s23  ;;  %s35_s13 = ssub.s32 %s1915_s24, %s2058_s15 }
  0x24   : > { %s393_s4 = sshll.u32 %s2234_s8, 4  ;;  %p45_p7 = scmp.ne.s32.totalorder %s1911_s23, %s1907_s22  ;;  %s394_s4 = int_to_ptr.hbm [resolvable:$true] %s393_s4 }
  0x25   : > { %1577 = dma.hbm_to_vmem [thread:$0]  (!%p2033_p6), %s394_s4, 1024, %s396_s12, [#allocation12], %s1919_s20, %s1919_s20, %s1920_s25  }
  0x26   : > { %p36_p8 = scmp.eq.s32.totalorder %s35_s13, 0  ;;  %p46_p9 = scmp.eq.s32.totalorder %s1915_s24, 0 }
  0x27   : > { %p51_p10 = scmp.ne.s32.totalorder %s1907_s22, %s1903_s21  ;;  %p306_p11 = scmp.eq.s32.totalorder %s2016_s28, 1 }
  0x28   : > { %s2070_s18 = scalar_select %p36_p8, %s1911_s23, %s38_s27  }
  0x29   : > { %p2074_p12 = por %p52_p1, %p51_p10  ;;  %p2078_p13 = por %p306_p11, %p45_p7 }
  0x2a   : > { %p312_p0 = scmp.eq.s32.totalorder %s1273_s14, 1  ;;  %p47_p2 = por %p46_p9, %p45_p7 }
  0x2b   : > { %s418_s25 = sand.u32 1, %s1911_s23   ;;  %p1591_p6 = scmp.lt.s32.totalorder %s1915_s24, 2 }
  0x2c   : > { %p2083_p5 = por %p312_p0, %p51_p10  ;;  %s1281_s19 = sshll.u32 %s418_s25, 3 }
  0x2d   : > { %s1282_s26 = sshll.u32 %s1915_s24, 3  ;;  %s422_s27 = scalar_lea.vmem [#allocation2], %s1281_s19 }
  0x2e   : > { %s426_s1 = scalar_lea.hbm %s2208_s0, %s1282_s26  ;;  %s430_s13 = sshll.u32 %s422_s27, 4  ;;  %s431_s13 = int_to_ptr.vmem [resolvable:$true] %s430_s13 }
  0x2f   : > { %s428_s12 = sshll.u32 %s426_s1, 4  ;;  %p2092_p8 = pnand %p1591_p6, %p47_p2  ;;  %s429_s12 = int_to_ptr.hbm [resolvable:$true] %s428_s12 }
  0x30   : > { %s419_s3 = scalar_lea.sflag [#allocation3], %s418_s25  ;;  %s1807_s6 = sshra.s32 %s429_s12, 4  ;;  %s1808_s6 = int_to_ptr.hbm [resolvable:$true] %s1807_s6 }
  0x31   : > { %s1809_s8 = scalar_lea.hbm %s1808_s6, 8  ;;  %p1811_p9 = pneg %p2092_p8 }
  0x32   : > { %p1810_p7 = scmp.ne.s32.totalorder %s1808_s6, %s1809_s8  ;;  %s1814_s19 = scalar_lea.hbm %s2208_s0, 16 }
  0x33   : > { %p1815_p0 = scmp.lt.s32.totalorder %s1808_s6, %s2208_s0  ;;  %p1816_p2 = scmp.lt.s32.totalorder %s1814_s19, %s1809_s8 }
  0x34   : > { %p1812_p10 = pnand %p1811_p9, %p1810_p7 }
  0x35   : > { %p1817_p6 = por %p1816_p2, %p1815_p0 }
  0x36   : > { %p1813_p11 = pneg %p1812_p10 }
  0x38   : > { %p1818_p4 = pnand %p1817_p6, %p1813_p11 }
  0x3a   : > { %1821 = shalt.err (!%p1818_p4)
}
  0x3b   : > { %1581 = dma.hbm_to_vmem [thread:$0]  (!%p2092_p8), %s429_s12, 128, %s431_s13, %s419_s3  }
  0x3c   : > { %439 = sbr.rel (%p2021_p3) target bundleno = 1740 (0x6cc), region = 68  ;;  %s2109_s25 = sand.u32 (!%p2021_p3), 1, %s1907_s22  }
  0x3d   : > { %s1284_s27 = sshll.u32 (!%p2021_p3), %s2109_s25, 3  ;;  %s442_s26 = scalar_lea.sflag (!%p2021_p3), [#allocation3], %s2109_s25 }
  0x3e   : > { %s445_s6 = scalar_lea.vmem (!%p2021_p3), [#allocation2], %s1284_s27 }
  0x41   : > { %1882 = dma.done.wait (%p2074_p12), %s442_s26, 128  }
  0x42   : > { %1884 = vsyncadd (%p2074_p12), %s442_s26, 4294967168 }
  0x43   : > { %1886 = dma.done.wait (%p52_p1), [#allocation6], 3088  }
  0x44   : > { %1888 = vsyncadd (%p52_p1), [#allocation6], 4294964208 }
  0x45   : > { %1890 = dma.done.wait (%p52_p1), [#allocation9], 2048  }
  0x46   : > { %1892 = vsyncadd (%p52_p1), [#allocation9], 4294965248 }
  0x47   : > { %1894 = dma.done.wait (%p52_p1), [#allocation12], 1024  }
  0x48   : > { %1896 = vsyncadd (%p52_p1), [#allocation12], 4294966272  ;;  %v514_v0 = vlaneseq  ;;  %v1926_v2 = vmov 0.0   ;;  %v2133_v4 = vld [vmem:[%s445_s6] sm:$0xff]  ;;  %v1378_v6 = vld [vmem:[#allocation7 + $0xa8] sm:$0xf] }
  0x49   : > { %v1512_v7 = vld [vmem:[#allocation7 + $0xb0] sm:$0xf0]  ;;  %v1511_v8 = vld [vmem:[#allocation7 + $0xac] sm:$0xf]  ;;  %v1380_v10 = vld [vmem:[#allocation7 + $0xb4] sm:$0xf0] }
  0x4a   : > { %v515_v1 = vand.u32 127, %v514_v0  ;;  %v1379_v9 = vor.u32 %v1512_v7, %v1378_v6  ;;  %v1386_v11 = vld [vmem:[#allocation7 + $0xb0] sm:$0xf]  ;;  %v1513_v12 = vld [vmem:[#allocation7 + $0xb8] sm:$0xf0]  ;;  %v1383_v13 = vor.u32 %v1511_v8, %v1380_v10  ;;  %vm797_vm4 = vcmask 1043456  }
  0x4b   : > { %v1387_v14 = vor.u32 %v1513_v12, %v1386_v11  ;;  %v1366_v20 = vld [vmem:[#allocation7 + $0x90] sm:$0xf]  ;;  %v1509_v21 = vld [vmem:[#allocation7 + $0x98] sm:$0xf0]  ;;  %v1508_v22 = vld [vmem:[#allocation7 + $0x94] sm:$0xf] }
  0x4c   : > { %vm516_vm0 = vcmp.lt.s32.totalorder %v515_v1, 32  ;;  %712 = vmatpush.bf16.msra.mxu0 %v1379_v9  ;;  %725 = vmatpush.bf16.msra.mxu1 %v1383_v13  ;;  %v1367_v23 = vor.u32 %v1509_v21, %v1366_v20  ;;  %v1368_v24 = vld [vmem:[#allocation7 + $0x9c] sm:$0xf0]  ;;  %v1374_v25 = vld [vmem:[#allocation7 + $0x98] sm:$0xf]  ;;  %vm768_vm5 = vcmask 64512  }
  0x4d   : > { %v2131_v3 = vsel %vm516_vm0, 1.0, %v1926_v2  ;;  %738 = vmatpush.bf16.msra.mxu2 %v1387_v14  ;;  %v1510_v26 = vld [vmem:[#allocation7 + $0xa0] sm:$0xf0]  ;;  %v1371_v27 = vor.u32 %v1508_v22, %v1368_v24  ;;  %v1354_v29 = vld [vmem:[#allocation7 + $0x78] sm:$0xf]  ;;  %s1487_s1 = sshll.u32 %s2016_s28, 3 }
  0x4e   : > { %v521_v5 = vmul.f32 %v2131_v3, %v2133_v4  ;;  %v1375_v28 = vor.u32 %v1510_v26, %v1374_v25  ;;  %v1506_v30 = vld [vmem:[#allocation7 + $0x80] sm:$0xf0]  ;;  %v1505_v31 = vld [vmem:[#allocation7 + $0x7c] sm:$0xf]  ;;  %v1356_v33 = vld [vmem:[#allocation7 + $0x84] sm:$0xf0] }
  0x4f   : > { %v1355_v32 = vor.u32 %v1506_v30, %v1354_v29  ;;  %v1362_v34 = vld [vmem:[#allocation7 + $0x80] sm:$0xf]  ;;  %v1507_v35 = vld [vmem:[#allocation7 + $0x88] sm:$0xf0]  ;;  %v1359_v36 = vor.u32 %v1505_v31, %v1356_v33  ;;  %v1502_v40 = vld [vmem:[#allocation7 + $0x64] sm:$0xf] }
  0x50   : > { %522 = vadd.xlane.f32.xlu0 %v521_v5  ;;  %713 = vmatpush.bf16.msra.mxu0 %v1367_v23  ;;  %v1363_v37 = vor.u32 %v1507_v35, %v1362_v34  ;;  %v1342_v38 = vld [vmem:[#allocation7 + $0x60] sm:$0xf]  ;;  %v1503_v39 = vld [vmem:[#allocation7 + $0x68] sm:$0xf0]  ;;  %v1344_v42 = vld [vmem:[#allocation7 + $0x6c] sm:$0xf0] }
  0x51   : > { %726 = vmatpush.bf16.msra.mxu1 %v1371_v27  ;;  %739 = vmatpush.bf16.msra.mxu2 %v1375_v28  ;;  %v1343_v41 = vor.u32 %v1503_v39, %v1342_v38  ;;  %v1350_v43 = vld [vmem:[#allocation7 + $0x68] sm:$0xf]  ;;  %v1504_v44 = vld [vmem:[#allocation7 + $0x70] sm:$0xf0]  ;;  %v1347_v45 = vor.u32 %v1502_v40, %v1344_v42  ;;  %v1499_v49 = vld [vmem:[#allocation7 + $0x4c] sm:$0xf] }
  0x52   : > { %v1351_v46 = vor.u32 %v1504_v44, %v1350_v43  ;;  %v1330_v47 = vld [vmem:[#allocation7 + $0x48] sm:$0xf]  ;;  %v1500_v48 = vld [vmem:[#allocation7 + $0x50] sm:$0xf0]  ;;  %v1332_v51 = vld [vmem:[#allocation7 + $0x54] sm:$0xf0] }
  0x53   : > { %v1331_v50 = vor.u32 %v1500_v48, %v1330_v47  ;;  %v1338_v52 = vld [vmem:[#allocation7 + $0x50] sm:$0xf]  ;;  %v1501_v53 = vld [vmem:[#allocation7 + $0x58] sm:$0xf0]  ;;  %v1335_v54 = vor.u32 %v1499_v49, %v1332_v51  ;;  %v1496_v58 = vld [vmem:[#allocation7 + $0x34] sm:$0xf] }
  0x54   : > { %714 = vmatpush.bf16.msra.mxu0 %v1355_v32  ;;  %v1339_v55 = vor.u32 %v1501_v53, %v1338_v52  ;;  %v1318_v56 = vld [vmem:[#allocation7 + $0x30] sm:$0xf]  ;;  %v1497_v57 = vld [vmem:[#allocation7 + $0x38] sm:$0xf0]  ;;  %v1320_v60 = vld [vmem:[#allocation7 + $0x3c] sm:$0xf0] }
  0x55   : > { %727 = vmatpush.bf16.msra.mxu1 %v1359_v36  ;;  %740 = vmatpush.bf16.msra.mxu2 %v1363_v37  ;;  %v1319_v59 = vor.u32 %v1497_v57, %v1318_v56  ;;  %v1326_v61 = vld [vmem:[#allocation7 + $0x38] sm:$0xf]  ;;  %v1498_v62 = vld [vmem:[#allocation7 + $0x40] sm:$0xf0]  ;;  %v1323_v63 = vor.u32 %v1496_v58, %v1320_v60  ;;  %v1493_v5 = vld [vmem:[#allocation7 + $0x1c] sm:$0xf] }
  0x56   : > { %v1327_v0 = vor.u32 %v1498_v62, %v1326_v61  ;;  %v1306_v1 = vld [vmem:[#allocation7 + $0x18] sm:$0xf]  ;;  %v1494_v2 = vld [vmem:[#allocation7 + $0x20] sm:$0xf0]  ;;  %v1308_v7 = vld [vmem:[#allocation7 + $0x24] sm:$0xf0] }
  0x57   : > { %v1307_v6 = vor.u32 %v1494_v2, %v1306_v1  ;;  %v1314_v8 = vld [vmem:[#allocation7 + $0x20] sm:$0xf]  ;;  %v1495_v9 = vld [vmem:[#allocation7 + $0x28] sm:$0xf0]  ;;  %v1311_v10 = vor.u32 %v1493_v5, %v1308_v7  ;;  %v1490_v14 = vld [vmem:[#allocation7 + $0x4] sm:$0xf] }
  0x58   : > { %715 = vmatpush.bf16.msra.mxu0 %v1343_v41  ;;  %v1315_v11 = vor.u32 %v1495_v9, %v1314_v8  ;;  %v1294_v12 = vld [vmem:[#allocation7] sm:$0xf]  ;;  %v1491_v13 = vld [vmem:[#allocation7 + $0x8] sm:$0xf0]  ;;  %v1640_v31 = vld [vmem:[#allocation5] ss:$0 sm:$0xff] }
  0x59   : > { %728 = vmatpush.bf16.msra.mxu1 %v1347_v45  ;;  %741 = vmatpush.bf16.msra.mxu2 %v1351_v46  ;;  %v1641_v34 = vld [vmem:[%s2210_s2] ss:$0 sm:$0xff]  ;;  %v1521_v56 = vld [vmem:[#allocation8 + $0x38] sm:$0xff]  ;;  %v1520_v57 = vld [vmem:[#allocation8 + $0x30] sm:$0xff]  ;;  %s2239_s29 = sld [smem:[#allocation24_spill]]  ;;  %s511_s12 = scalar_lea.vmem [#allocation13], %s1284_s27 }
  0x5a   : > { %v1519_v58 = vld [vmem:[#allocation8 + $0x28] sm:$0xff]  ;;  %v1518_v60 = vld [vmem:[#allocation8 + $0x20] sm:$0xff]  ;;  %v1517_v61 = vld [vmem:[#allocation8 + $0x18] sm:$0xff]  ;;  %s1152_s13 = sshll.u32 %s511_s12, 4  ;;  %s1140_s28 = scalar_lea.sflag [#allocation4], %s2109_s25  ;;  %s1153_s13 = int_to_ptr.vmem [resolvable:$true] %s1152_s13 }
  0x5b   : > { %v1515_v7 = vld [vmem:[#allocation8 + $0x8] sm:$0xff] }
  0x5c   : > { %716 = vmatpush.bf16.msra.mxu0 %v1331_v50 }
  0x5d   : > { %729 = vmatpush.bf16.msra.mxu1 %v1335_v54  ;;  %742 = vmatpush.bf16.msra.mxu2 %v1339_v55 }
  0x5f   : > { %s1150_s17 = scalar_lea.hbm %s2239_s29, %s1487_s1  ;;  %s1857_s27 = scalar_lea.hbm %s2239_s29, 16 }
  0x60   : > { %717 = vmatpush.bf16.msra.mxu0 %v1319_v59  ;;  %s1154_s14 = sshll.u32 %s1150_s17, 4  ;;  %s1155_s14 = int_to_ptr.hbm [resolvable:$true] %s1154_s14 }
  0x61   : > { %730 = vmatpush.bf16.msra.mxu1 %v1323_v63  ;;  %743 = vmatpush.bf16.msra.mxu2 %v1327_v0  ;;  %v1516_v0 = vld [vmem:[#allocation8 + $0x10] sm:$0xff]  ;;  %s1851_s30 = sshra.s32 %s1155_s14, 4  ;;  %s1852_s30 = int_to_ptr.hbm [resolvable:$true] %s1851_s30 }
  0x62   : > { %s1853_s19 = scalar_lea.hbm %s1852_s30, 8  ;;  %p1858_p12 = scmp.lt.s32.totalorder %s1852_s30, %s2239_s29 }
  0x63   : > { %p1854_p1 = scmp.ne.s32.totalorder %s1852_s30, %s1853_s19  ;;  %p1859_p8 = scmp.lt.s32.totalorder %s1857_s27, %s1853_s19 }
  0x64   : > { %718 = vmatpush.bf16.msra.mxu0 %v1307_v6 }
  0x65   : > { %731 = vmatpush.bf16.msra.mxu1 %v1311_v10  ;;  %744 = vmatpush.bf16.msra.mxu2 %v1315_v11  ;;  %p1855_p3 = pnand %p1854_p1, %p2078_p13  ;;  %p1860_p7 = por %p1859_p8, %p1858_p12 }
  0x67   : > { %p1856_p4 = pneg %p1855_p3 }
  0x69   : > { %p1861_p9 = pnand %p1860_p7, %p1856_p4 }
  0xc3   : > { %v523_v15 = vpop.xlane.xlu0 %522 }
  0xc4   : > { %v524_v16 = vmul.f32 0.03125, %v523_v15  ;;  %v1295_v15 = vor.u32 %v1491_v13, %v1294_v12 }
  0xc6   : > { %v2138_v17 = vsub.f32 %v2133_v4, %v524_v16  ;;  %v1296_v16 = vld [vmem:[#allocation7 + $0xc] sm:$0xf0]  ;;  %719 = vmatpush.bf16.msra.mxu0 %v1295_v15 }
  0xc7   : > { %v1299_v20 = vor.u32 %v1490_v14, %v1296_v16  ;;  %v1514_v14 = vld [vmem:[#allocation8] sm:$0xff] }
  0xc8   : > { %v526_v18 = vmul.f32 %v2138_v17, %v2138_v17 }
  0xc9   : > { %732 = vmatpush.bf16.msra.mxu1 %v1299_v20 }
  0xca   : > { %v527_v19 = vmul.f32 %v2131_v3, %v526_v18  ;;  %v1302_v18 = vld [vmem:[#allocation7 + $0x8] sm:$0xf] }
  0xcc   : > { %528 = vadd.xlane.f32.xlu0 %v527_v19  ;;  %v1492_v19 = vld [vmem:[#allocation7 + $0x10] sm:$0xf0] }
  0xcd   : > { %v1303_v21 = vor.u32 %v1492_v19, %v1302_v18  ;;  %v1642_v19 = vld [vmem:[%s2213_s5] ss:$0 sm:$0xff] }
  0xcf   : > { %745 = vmatpush.bf16.msra.mxu2 %v1303_v21 }
 0x13f   : > { %v529_v22 = vpop.xlane.xlu0 %528 }
 0x140   : > { %v530_v23 = vmul.f32 0.03125, %v529_v22 }
 0x142   : > { %v531_v24 = vadd.f32 1e-05, %v530_v23 }
 0x144   : > { %1647 = vrsqrt.f32 %v531_v24  ;;  %vm538_vm2 = vweird.f32 %v531_v24 }
 0x14a   : > { %v1648_v25 = vpop.eup %1647 }
 0x14b   : > { %v533_v26 = vmul.f32 %v1648_v25, %v531_v24  ;;  %vm539_vm1 = vweird.f32 %v1648_v25 }
 0x14c   : > { %vm540_vm3 = vmor %vm538_vm2, %vm539_vm1 }
 0x14d   : > { %v534_v27 = vmul.f32 %v1648_v25, %v533_v26 }
 0x14f   : > { %v535_v28 = vmul.f32 0.5, %v534_v27 }
 0x151   : > { %v536_v29 = vsub.f32 1.5, %v535_v28 }
 0x153   : > { %v537_v30 = vmul.f32 %v1648_v25, %v536_v29 }
 0x155   : > { %v541_v32 = vsel %vm540_vm3, %v1648_v25, %v537_v30  ;;  %v1529_v25 = vld [vmem:[#allocation10 + $0x38] sm:$0xff] }
 0x156   : > { %v542_v33 = vmul.f32 %v541_v32, %v2138_v17  ;;  %998 = vmatpush.bf16.msrb.mxu0 %v1529_v25  ;;  %v1527_v32 = vld [vmem:[#allocation10 + $0x28] sm:$0xff] }
 0x158   : > { %v546_v35 = vmul.f32 %v1640_v31, %v542_v33  ;;  %v1528_v31 = vld [vmem:[#allocation10 + $0x30] sm:$0xff]  ;;  %v1526_v33 = vld [vmem:[#allocation10 + $0x20] sm:$0xff] }
 0x15a   : > { %v550_v36 = vadd.f32 %v1641_v34, %v546_v35  ;;  %999 = vmatpush.bf16.msrb.mxu0 %v1528_v31  ;;  %v1524_v34 = vld [vmem:[#allocation10 + $0x10] sm:$0xff]  ;;  %v1523_v35 = vld [vmem:[#allocation10 + $0x8] sm:$0xff] }
 0x15c   : > { %v551_v37 = vpack.c.bf16 %v550_v36, %v550_v36  ;;  %v1522_v36 = vld [vmem:[#allocation10] sm:$0xff] }
 0x15e   : > { %720 = vmatmul.bf16.vlgmr.msra.gmra.mxu0 %v551_v37  ;;  %733 = vmatmul.bf16.vlgmr.msra.gmra.mxu1 %v551_v37 }
 0x15f   : > { %746 = vmatmul.bf16.vlgmr.msra.gmra.mxu2 %v551_v37  ;;  %1000 = vmatpush.bf16.msrb.mxu0 %v1527_v32 }
 0x163   : > { %1001 = vmatpush.bf16.msrb.mxu0 %v1526_v33 }
 0x1db   : > { %v721_v38 = vpop.f32.mrf.mxu0  ;;  %v734_v39 = vpop.f32.mrf.mxu1 }
 0x1dc   : > { %v753_v40 = vpack.c.bf16 %v734_v39, %v734_v39  ;;  %v751_v41 = vmul.f32 0.17677669, %v721_v38 }
 0x1de   : > { %762 = vmatpush.bf16.xpose.msra.mxu3 %v753_v40  ;;  %v752_v43 = vpack.c.bf16 %v751_v41, %v751_v41 }
 0x1e2   : > { %v747_v42 = vpop.f32.mrf.mxu2 }
 0x1e3   : > { %v754_v44 = vpack.c.bf16 %v747_v42, %v747_v42  ;;  %v723_v17 = vpop.f32.mrf.mxu0  ;;  %v736_v45 = vpop.f32.mrf.mxu1 }
 0x1e4   : > { %v1643_v17 = vld [vmem:[%s2218_s10] ss:$0 sm:$0xff] }
 0x1e5   : > { %763 = vmatmul.bf16.vlgmr.msra.gmra.mxu3 %v752_v43  ;;  %v799_v46 = vsel %vm797_vm4, %v754_v44, 0 }
 0x1e6   : > { %808 = vmatpush.bf16.msrb.mxu3 %v799_v46 }
 0x1ea   : > { %v749_v47 = vpop.f32.mrf.mxu2  ;;  %883 = vmatpush.bf16.msra.mxu3 %v1521_v56 }
 0x1eb   : > { %v1644_v47 = vld [vmem:[%s2219_s11] ss:$0 sm:$0xff] }
 0x1ee   : > { %884 = vmatpush.bf16.msra.mxu3 %v1520_v57 }
 0x1f2   : > { %885 = vmatpush.bf16.msra.mxu3 %v1519_v58  ;;  %v1534_v58 = vld [vmem:[#allocation11 + $0x20] sm:$0xff] }
 0x1f6   : > { %886 = vmatpush.bf16.msra.mxu3 %v1518_v60 }
 0x1fa   : > { %887 = vmatpush.bf16.msra.mxu3 %v1517_v61 }
 0x1fe   : > { %888 = vmatpush.bf16.msra.mxu3 %v1516_v0 }
 0x202   : > { %889 = vmatpush.bf16.msra.mxu3 %v1515_v7 }
 0x206   : > { %890 = vmatpush.bf16.msra.mxu3 %v1514_v14 }
 0x268   : > { %v764_v48 = vpop.f32.mrf.mxu3 }
 0x269   : > { %v769_v49 = vsel %vm768_vm5, %v764_v48, -inf }
 0x26a   : > { %770 = vmax.xlane.f32.xlu1 %v769_v49 }
 0x270   : > { %v766_v50 = vpop.f32.mrf.mxu3 }
 0x2dd   : > { %v771_v51 = vpop.xlane.xlu1 %770 }
 0x2de   : > { %v772_v52 = vsub.f32 %v764_v48, %v771_v51  ;;  %v1537_v51 = vld [vmem:[#allocation11 + $0x38] sm:$0xff] }
 0x2df   : > { %1124 = vmatpush.bf16.msrb.mxu1 %v1537_v51 }
 0x2e0   : > { %v773_v53 = vmul.f32 1.442695, %v772_v52  ;;  %v1536_v52 = vld [vmem:[#allocation11 + $0x30] sm:$0xff] }
 0x2e2   : > { %1649 = vpow2.f32 %v773_v53  ;;  %v1645_v53 = vld [vmem:[%s2215_s7] ss:$0 sm:$0xff] }
 0x2e3   : > { %1125 = vmatpush.bf16.msrb.mxu1 %v1536_v52 }
 0x2e8   : > { %v1650_v54 = vpop.eup %1649 }
 0x2e9   : > { %v775_v55 = vsel %vm768_vm5, %v1650_v54, 0.0 }
 0x2ea   : > { %776 = vadd.xlane.f32.xlu1 %v775_v55  ;;  %v1535_v55 = vld [vmem:[#allocation11 + $0x28] sm:$0xff] }
 0x2eb   : > { %1126 = vmatpush.bf16.msrb.mxu1 %v1535_v55 }
 0x2ef   : > { %1127 = vmatpush.bf16.msrb.mxu1 %v1534_v58 }
 0x35d   : > { %v777_v59 = vpop.xlane.xlu1 %776 }
 0x35e   : > { %1651 = vrcp.f32 %v777_v59  ;;  %v789_v2 = vand.u32 2147483648, %v777_v59  ;;  %v787_v6 = vand.u32 2147483647, %v777_v59  ;;  %vm783_vm7 = vweird.f32 %v777_v59 }
 0x360   : > { %v790_v9 = vor.u32 1.1754944e-38, %v789_v2  ;;  %vm788_vm9 = vcmp.eq.f32.partialorder %v787_v6, 8.507059e+37 }
 0x364   : > { %v1652_v62 = vpop.eup %1651 }
 0x365   : > { %v779_v63 = vmul.f32 %v1652_v62, %v777_v59  ;;  %vm784_vm6 = vweird.f32 %v1652_v62 }
 0x366   : > { %vm785_vm8 = vmor %vm783_vm7, %vm784_vm6 }
 0x367   : > { %v780_v1 = vsub.f32 1.0, %v779_v63 }
 0x369   : > { %v781_v5 = vmul.f32 %v1652_v62, %v780_v1 }
 0x36b   : > { %v782_v8 = vadd.f32 %v1652_v62, %v781_v5  ;;  %v1532_v5 = vld [vmem:[#allocation11 + $0x10] sm:$0xff] }
 0x36d   : > { %v786_v10 = vsel %vm785_vm8, %v1652_v62, %v782_v8  ;;  %v1533_v62 = vld [vmem:[#allocation11 + $0x18] sm:$0xff]  ;;  %v1531_v8 = vld [vmem:[#allocation11 + $0x8] sm:$0xff] }
 0x36e   : > { %v791_v11 = vsel %vm788_vm9, %v790_v9, %v786_v10  ;;  %1128 = vmatpush.bf16.msrb.mxu1 %v1533_v62 }
 0x36f   : > { %v792_v12 = vmul.f32 %v1650_v54, %v791_v11 }
 0x371   : > { %v793_v13 = vpack.c.bf16 %v792_v12, %v792_v12  ;;  %v1530_v12 = vld [vmem:[#allocation11] sm:$0xff] }
 0x372   : > { %1129 = vmatpush.bf16.msrb.mxu1 %v1532_v5 }
 0x373   : > { %1388 = vmatmul.msk.bf16.vlgmr.msrb.gmra.mxu3 %vm768_vm5, %v793_v13 }
 0x376   : > { %1130 = vmatpush.bf16.msrb.mxu1 %v1531_v8 }
 0x37a   : > { %1131 = vmatpush.bf16.msrb.mxu1 %v1530_v12 }
 0x3f6   : > { %v810_v15 = vpop.f32.mrf.mxu3 }
 0x3f7   : > { %v814_v16 = vpack.c.bf16 %v810_v15, %v810_v15 }
 0x3f9   : > { %891 = vmatmul.bf16.vlgmr.msra.gmra.mxu3 %v814_v16 }
 0x3fe   : > { %v812_v18 = vpop.f32.mrf.mxu3 }
 0x47c   : > { %v892_v20 = vpop.f32.mrf.mxu3 }
 0x47d   : > { %v893_v21 = vadd.f32 %v1642_v19, %v892_v20 }
 0x47f   : > { %v896_v22 = vadd.f32 %v893_v21, %v2133_v4  ;;  %v1525_v4 = vld [vmem:[#allocation10 + $0x18] sm:$0xff] }
 0x480   : > { %1002 = vmatpush.bf16.msrb.mxu0 %v1525_v4 }
 0x481   : > { %v899_v23 = vmul.f32 %v2131_v3, %v896_v22 }
 0x483   : > { %900 = vadd.xlane.f32.xlu2 %v899_v23 }
 0x484   : > { %v894_v24 = vpop.f32.mrf.mxu3  ;;  %1003 = vmatpush.bf16.msrb.mxu0 %v1524_v34 }
 0x488   : > { %1004 = vmatpush.bf16.msrb.mxu0 %v1523_v35 }
 0x48c   : > { %1005 = vmatpush.bf16.msrb.mxu0 %v1522_v36 }
 0x4f6   : > { %v901_v26 = vpop.xlane.xlu2 %900 }
 0x4f7   : > { %v902_v27 = vmul.f32 0.03125, %v901_v26 }
 0x4f9   : > { %v903_v28 = vsub.f32 %v896_v22, %v902_v27 }
 0x4fb   : > { %v904_v29 = vmul.f32 %v903_v28, %v903_v28 }
 0x4fd   : > { %v905_v30 = vmul.f32 %v2131_v3, %v904_v29 }
 0x4ff   : > { %906 = vadd.xlane.f32.xlu2 %v905_v30 }
 0x572   : > { %v907_v37 = vpop.xlane.xlu2 %906 }
 0x573   : > { %v908_v38 = vmul.f32 0.03125, %v907_v37 }
 0x575   : > { %v909_v39 = vadd.f32 1e-05, %v908_v38 }
 0x577   : > { %1653 = vrsqrt.f32 %v909_v39  ;;  %vm916_vm11 = vweird.f32 %v909_v39 }
 0x57d   : > { %v1654_v3 = vpop.eup %1653 }
 0x57e   : > { %v911_v40 = vmul.f32 %v1654_v3, %v909_v39  ;;  %vm917_vm10 = vweird.f32 %v1654_v3 }
 0x57f   : > { %vm918_vm12 = vmor %vm916_vm11, %vm917_vm10 }
 0x580   : > { %v912_v41 = vmul.f32 %v1654_v3, %v911_v40  ;;  %v1646_v40 = vld [vmem:[%s2217_s9] ss:$0 sm:$0xff] }
 0x582   : > { %v913_v42 = vmul.f32 0.5, %v912_v41 }
 0x584   : > { %v914_v43 = vsub.f32 1.5, %v913_v42 }
 0x586   : > { %v915_v44 = vmul.f32 %v1654_v3, %v914_v43 }
 0x588   : > { %v919_v45 = vsel %vm918_vm12, %v1654_v3, %v915_v44 }
 0x589   : > { %v920_v46 = vmul.f32 %v919_v45, %v903_v28 }
 0x58b   : > { %v924_v48 = vmul.f32 %v1643_v17, %v920_v46 }
 0x58d   : > { %v2162_v49 = vadd.f32 %v1644_v47, %v924_v48 }
 0x58f   : > { %v929_v50 = vpack.c.bf16 %v2162_v49, %v2162_v49 }
 0x591   : > { %1006 = vmatmul.bf16.vlgmr.msrb.gmra.mxu0 %v929_v50 }
 0x60e   : > { %v1007_v54 = vpop.f32.mrf.mxu0 }
 0x60f   : > { %v1008_v56 = vadd.f32 %v1645_v53, %v1007_v54 }
 0x611   : > { %v1012_v57 = vmul.f32 0.70710677, %v1008_v56  ;;  %v1011_v37 = vmul.f32 0.5, %v1008_v56 }
 0x613   : > { %v1013_v59 = vmul.f32 %v1012_v57, %v1012_v57 }
 0x615   : > { %v1014_v60 = vmin.f32 %v1013_v59, 16.0 }
 0x616   : > { %v1009_v61 = vpop.f32.mrf.mxu0 }
 0x617   : > { %v1015_v63 = vmul.f32 2.1237322e-06, %v1014_v60  ;;  %v1026_v0 = vmul.f32 3.8918573e-05, %v1014_v60 }
 0x619   : > { %v1016_v1 = vadd.f32 0.00028619796, %v1015_v63  ;;  %v1027_v2 = vadd.f32 0.001143296, %v1026_v0 }
 0x61b   : > { %v1017_v6 = vmul.f32 %v1016_v1, %v1014_v60  ;;  %v1028_v7 = vmul.f32 %v1027_v2, %v1014_v60 }
 0x61d   : > { %v1029_v9 = vadd.f32 0.014752088, %v1028_v7  ;;  %v1018_v10 = vadd.f32 0.0036580483, %v1017_v6 }
 0x61f   : > { %v1030_v11 = vmul.f32 %v1029_v9, %v1014_v60  ;;  %v1019_v14 = vmul.f32 %v1018_v10, %v1014_v60 }
 0x621   : > { %v1031_v13 = vadd.f32 0.112945676, %v1030_v11  ;;  %v1020_v18 = vadd.f32 0.05243302, %v1019_v14 }
 0x623   : > { %v1032_v15 = vmul.f32 %v1031_v13, %v1014_v60  ;;  %v1021_v21 = vmul.f32 %v1020_v18, %v1014_v60 }
 0x625   : > { %v1033_v16 = vadd.f32 0.4994258, %v1032_v15  ;;  %v1022_v22 = vadd.f32 0.18741608, %v1021_v21 }
 0x627   : > { %v1034_v19 = vmul.f32 %v1033_v16, %v1014_v60  ;;  %v1023_v24 = vmul.f32 %v1022_v22, %v1014_v60 }
 0x629   : > { %v1035_v20 = vadd.f32 1.0, %v1034_v19  ;;  %v1024_v28 = vadd.f32 1.1283791, %v1023_v24 }
 0x62b   : > { %1655 = vrcp.f32 %v1035_v20  ;;  %v1047_v27 = vand.u32 2147483648, %v1035_v20  ;;  %v1045_v30 = vand.u32 2147483647, %v1035_v20  ;;  %vm1041_vm14 = vweird.f32 %v1035_v20 }
 0x62c   : > { %v1025_v33 = vmul.f32 %v1024_v28, %v1012_v57 }
 0x62d   : > { %v1048_v32 = vor.u32 1.1754944e-38, %v1047_v27  ;;  %vm1046_vm0 = vcmp.eq.f32.partialorder %v1045_v30, 8.507059e+37 }
 0x631   : > { %v1656_v23 = vpop.eup %1655 }
 0x632   : > { %v1037_v25 = vmul.f32 %v1656_v23, %v1035_v20  ;;  %vm1042_vm13 = vweird.f32 %v1656_v23 }
 0x633   : > { %vm1043_vm15 = vmor %vm1041_vm14, %vm1042_vm13 }
 0x634   : > { %v1038_v26 = vsub.f32 1.0, %v1037_v25 }
 0x636   : > { %v1039_v29 = vmul.f32 %v1656_v23, %v1038_v26 }
 0x638   : > { %v1040_v31 = vadd.f32 %v1656_v23, %v1039_v29 }
 0x63a   : > { %v1044_v4 = vsel %vm1043_vm15, %v1656_v23, %v1040_v31 }
 0x63b   : > { %v1049_v34 = vsel %vm1046_vm0, %v1048_v32, %v1044_v4 }
 0x63c   : > { %v1050_v35 = vmul.f32 %v1049_v34, %v1025_v33 }
 0x63e   : > { %v1453_v36 = vclamps-f32 %v1050_v35, 1.0 }
 0x640   : > { %v1053_v38 = vadd.f32 1.0, %v1453_v36 }
 0x642   : > { %v1054_v39 = vmul.f32 %v1053_v38, %v1011_v37 }
 0x644   : > { %v1055_v3 = vpack.c.bf16 %v1054_v39, %v1054_v39 }
 0x646   : > { %1132 = vmatmul.bf16.vlgmr.msrb.gmra.mxu1 %v1055_v3 }
 0x6c3   : > { %v1133_v41 = vpop.f32.mrf.mxu1 }
 0x6c4   : > { %v1134_v42 = vadd.f32 %v1646_v40, %v1133_v41 }
 0x6c6   : > { %v1137_v43 = vadd.f32 %v1134_v42, %v2162_v49 }
 0x6c8   : > { %1138 = vst [vmem:[%s511_s12] sm:$0xff] %v1137_v43 }
 0x6c9   : > { %1864 = shalt.err (!%p1861_p9)
}
 0x6ca   : > { %1560 = dma.vmem_to_hbm [thread:$0]  (%p2078_p13), %s1153_s13, 128, %s1155_s14, %s1140_s28  }
 0x6cb   : > { %v1135_v44 = vpop.f32.mrf.mxu1 }
 0x6cc PF: > { %s1166_s25 = sand.u32 1, %s1903_s21   ;;  %p2240_p10 = scmp.ge.s32.totalorder %s1915_s24, 2 }
 0x6cd   : > { %s1167_s3 = scalar_lea.sflag [#allocation4], %s1166_s25 }
 0x6ce   : > { %p1583_p11 = pnand %p2240_p10, %p2083_p5 }
 0x6d0   : > { %p1584_p0 = pneg %p1583_p11 }
 0x6d2   : > { %1898 = dma.done.wait (%p1584_p0), %s1167_s3, 128  }
 0x6d3   : > { %1900 = vsyncadd (%p1584_p0), %s1167_s3, 4294967168  ;;  %p28_p2 = scmp.ge.s32.totalorder %s2058_s15, 4   ;;  %s2241_s21 = smov %s1907_s22 }
 0x6d4   : > { %s2242_s22 = smov %s1911_s23  ;;  %s2243_s23 = smov %s2070_s18 }
 0x6d5   : > { %s2244_s24 = smov %s2058_s15  ;;  %30 = sbr.rel (!%p28_p2) target bundleno = 15 (0xf), region = 133 }
 0x6da   :  { %1173 = vsyncpa [#allocation3], 1 }
 0x6db   :  { %1175 = vsyncpa [#allocation3 + $0x1], 1 }
 0x6dc   :  { %1176 = vsyncpa [#allocation6], 1 }
 0x6dd   :  { %1177 = vsyncpa [#allocation9], 1 }
 0x6de   :  { %1178 = vsyncpa [#allocation12], 1 }
 0x6df   :  { %1179 = vsyncpa [#allocation4], 1 }
 0x6e0   :  { %1181 = vsyncpa [#allocation4 + $0x1], 1 }

// kernel: tpu_custom_call.1
= control target key start
LH: loop header
LB: loop body
LE: loop exit
PB: predicated region body
PF: predicated region fallthrough
CT: control target
= control target key end

     0   :  { %s2208_s0 = inlined_call_operand.hbm [shape: f32[2,8,128], index: 0, kind: input, shape index: {}]   ;;  %s2209_s1 = inlined_call_operand.hbm [shape: f32[1,128], index: 1, kind: input, shape index: {}]   ;;  %s2210_s2 = inlined_call_operand.vmem [shape: f32[1,128], index: 2, kind: input, shape index: {}]   ;;  %s2211_s3 = inlined_call_operand.hbm [shape: bf16[128,384], index: 3, kind: input, shape index: {}]   ;;  %s2212_s4 = inlined_call_operand.hbm [shape: bf16[128,128], index: 4, kind: input, shape index: {}]   ;;  %s2213_s5 = inlined_call_operand.vmem [shape: f32[1,128], index: 5, kind: input, shape index: {}]   ;;  %s2214_s6 = inlined_call_operand.hbm [shape: bf16[128,128], index: 6, kind: input, shape index: {}]   ;;  %s2215_s7 = inlined_call_operand.vmem [shape: f32[1,128], index: 7, kind: input, shape index: {}]   ;;  %s2216_s8 = inlined_call_operand.hbm [shape: bf16[128,128], index: 8, kind: input, shape index: {}]   ;;  %s2217_s9 = inlined_call_operand.vmem [shape: f32[1,128], index: 9, kind: input, shape index: {}]   ;;  %s2218_s10 = inlined_call_operand.vmem [shape: f32[1,128], index: 10, kind: input, shape index: {}]   ;;  %s2219_s11 = inlined_call_operand.vmem [shape: f32[1,128], index: 11, kind: input, shape index: {}]   ;;  %s2220_s12 = inlined_call_operand.hbm [shape: f32[2,8,128], index: 12, kind: output, shape index: {}]  }
   0x1   :  { %2222 = sst [smem:[#allocation19_spill]] %s2209_s1 }
   0x2   :  { %2223 = sst [smem:[#allocation20_spill]] %s2211_s3 }
   0x3   :  { %2224 = sst [smem:[#allocation21_spill]] %s2212_s4 }
   0x4   :  { %2225 = sst [smem:[#allocation22_spill]] %s2214_s6 }
   0x5   :  { %2226 = sst [smem:[#allocation23_spill]] %s2216_s8 }
   0x6   :  { %2227 = sst [smem:[#allocation24_spill]] %s2220_s12 }
   0x7   :  { %17 = vsyncpa [#allocation3], 0 }
   0x8   :  { %19 = vsyncpa [#allocation3 + $0x1], 0 }
   0x9   :  { %20 = vsyncpa [#allocation6], 0 }
   0xa   :  { %21 = vsyncpa [#allocation9], 0 }
   0xb   :  { %22 = vsyncpa [#allocation12], 0 }
   0xc   :  { %23 = vsyncpa [#allocation4], 0 }
   0xd   :  { %25 = vsyncpa [#allocation4 + $0x1], 0  ;;  %s1992_s21 = smov 0   ;;  %s1994_s22 = smov 0  }
   0xe   :  { %s1996_s23 = smov 0   ;;  %s1998_s24 = smov 0  }
   0xf LB: > { %s2228_s1 = sld [smem:[#allocation19_spill]]  ;;  %s2016_s28 = sadd.s32 4294967295, %s1915_s24   ;;  %s1915_s24 = sphi %s1998_s24, %s2244_s24   ;;  %s1911_s23 = sphi %s1996_s23, %s2243_s23   ;;  %s1907_s22 = sphi %s1994_s22, %s2242_s22   ;;  %s1903_s21 = sphi %s1992_s21, %s2241_s21  }
  0x10   : > { %p1274_p0 = scmp.ge.s32.totalorder %s1915_s24, 1  ;;  %p52_p1 = scmp.eq.s32.totalorder %s2016_s28, 0 }
  0x11   : > { %p319_p2 = scmp.lt.s32.totalorder %s1915_s24, 3  ;;  %s1917_s30 = smov [#allocation5]  }
  0x12   : > { %s333_s13 = sshll.u32 %s1917_s30, 4  ;;  %s2230_s4 = sld [smem:[#allocation21_spill]]  ;;  %s334_s13 = int_to_ptr.vmem [resolvable:$true] %s333_s13 }
  0x13   : > { %p2021_p3 = pnand %p1274_p0, %p319_p2  ;;  %s1918_s18 = smov [#allocation8]  }
  0x14   : > { %s361_s19 = sshll.u32 %s1918_s18, 4  ;;  %s1919_s20 = smov 64   ;;  %s362_s19 = int_to_ptr.vmem [resolvable:$true] %s361_s19 }
  0x15   : > { %s331_s27 = sshll.u32 %s2228_s1, 4  ;;  %p1562_p5 = pneg %p2021_p3  ;;  %s332_s27 = int_to_ptr.hbm [resolvable:$true] %s331_s27 }
  0x16   : > { %s1920_s25 = smov 4   ;;  %s2232_s3 = sld [smem:[#allocation20_spill]] }
  0x17   : > { %p2033_p6 = pnand %p1562_p5, %p52_p1  ;;  %s1921_s15 = smov [#allocation7]  }
  0x18   : > { %s359_s16 = sshll.u32 %s2230_s4, 4  ;;  %s347_s1 = sshll.u32 %s1921_s15, 4  ;;  %s360_s16 = int_to_ptr.hbm [resolvable:$true] %s359_s16  ;;  %s348_s1 = int_to_ptr.vmem [resolvable:$true] %s347_s1 }
  0x19   : > { %1565 = dma.hbm_to_vmem [thread:$0]  (!%p2033_p6), %s332_s27, 16, %s334_s13, [#allocation6]  }
  0x1a   : > { %1571 = dma.hbm_to_vmem [thread:$0]  (!%p2033_p6), %s360_s16, 1024, %s362_s19, [#allocation9], %s1919_s20, %s1919_s20, %s1920_s25  }
  0x1b   : > { %s2233_s6 = sld [smem:[#allocation22_spill]]  ;;  %s1922_s27 = smov 192  }
  0x1c   : > { %s345_s14 = sshll.u32 %s2232_s3, 4  ;;  %s1923_s13 = smov 12   ;;  %s346_s14 = int_to_ptr.hbm [resolvable:$true] %s345_s14 }
  0x1d   : > { %1568 = dma.hbm_to_vmem [thread:$0]  (!%p2033_p6), %s346_s14, 3072, %s348_s1, [#allocation6], %s1922_s27, %s1922_s27, %s1923_s13  }
  0x1e   : > { %s1924_s16 = smov [#allocation10]   ;;  %s2234_s8 = sld [smem:[#allocation23_spill]] }
  0x1f   : > { %s378_s19 = sshll.u32 %s1924_s16, 4  ;;  %s1925_s1 = smov [#allocation11]   ;;  %s379_s19 = int_to_ptr.vmem [resolvable:$true] %s378_s19 }
  0x20   : > { %s395_s12 = sshll.u32 %s1925_s1, 4  ;;  %s1273_s14 = sadd.s32 4294967294, %s1915_s24   ;;  %s396_s12 = int_to_ptr.vmem [resolvable:$true] %s395_s12 }
  0x21   : > { %s376_s18 = sshll.u32 %s2233_s6, 4  ;;  %s2058_s15 = sadd.s32 1, %s1915_s24   ;;  %s377_s18 = int_to_ptr.hbm [resolvable:$true] %s376_s18 }
  0x22   : > { %1574 = dma.hbm_to_vmem [thread:$0]  (!%p2033_p6), %s377_s18, 1024, %s379_s19, [#allocation9], %s1919_s20, %s1919_s20, %s1920_s25  }
  0x23   : > { %s38_s27 = sadd.s32 1, %s1911_s23  ;;  %s35_s13 = ssub.s32 %s1915_s24, %s2058_s15 }
  0x24   : > { %s393_s4 = sshll.u32 %s2234_s8, 4  ;;  %p45_p7 = scmp.ne.s32.totalorder %s1911_s23, %s1907_s22  ;;  %s394_s4 = int_to_ptr.hbm [resolvable:$true] %s393_s4 }
  0x25   : > { %1577 = dma.hbm_to_vmem [thread:$0]  (!%p2033_p6), %s394_s4, 1024, %s396_s12, [#allocation12], %s1919_s20, %s1919_s20, %s1920_s25  }
  0x26   : > { %p36_p8 = scmp.eq.s32.totalorder %s35_s13, 0  ;;  %p46_p9 = scmp.eq.s32.totalorder %s1915_s24, 0 }
  0x27   : > { %p51_p10 = scmp.ne.s32.totalorder %s1907_s22, %s1903_s21  ;;  %p306_p11 = scmp.eq.s32.totalorder %s2016_s28, 1 }
  0x28   : > { %s2070_s18 = scalar_select %p36_p8, %s1911_s23, %s38_s27  }
  0x29   : > { %p2074_p12 = por %p52_p1, %p51_p10  ;;  %p2078_p13 = por %p306_p11, %p45_p7 }
  0x2a   : > { %p312_p0 = scmp.eq.s32.totalorder %s1273_s14, 1  ;;  %p47_p2 = por %p46_p9, %p45_p7 }
  0x2b   : > { %s418_s25 = sand.u32 1, %s1911_s23   ;;  %p1591_p6 = scmp.lt.s32.totalorder %s1915_s24, 2 }
  0x2c   : > { %p2083_p5 = por %p312_p0, %p51_p10  ;;  %s1281_s19 = sshll.u32 %s418_s25, 3 }
  0x2d   : > { %s1282_s26 = sshll.u32 %s1915_s24, 3  ;;  %s422_s27 = scalar_lea.vmem [#allocation2], %s1281_s19 }
  0x2e   : > { %s426_s1 = scalar_lea.hbm %s2208_s0, %s1282_s26  ;;  %s430_s13 = sshll.u32 %s422_s27, 4  ;;  %s431_s13 = int_to_ptr.vmem [resolvable:$true] %s430_s13 }
  0x2f   : > { %s428_s12 = sshll.u32 %s426_s1, 4  ;;  %p2092_p8 = pnand %p1591_p6, %p47_p2  ;;  %s429_s12 = int_to_ptr.hbm [resolvable:$true] %s428_s12 }
  0x30   : > { %s419_s3 = scalar_lea.sflag [#allocation3], %s418_s25  ;;  %s1807_s6 = sshra.s32 %s429_s12, 4  ;;  %s1808_s6 = int_to_ptr.hbm [resolvable:$true] %s1807_s6 }
  0x31   : > { %s1809_s8 = scalar_lea.hbm %s1808_s6, 8  ;;  %p1811_p9 = pneg %p2092_p8 }
  0x32   : > { %p1810_p7 = scmp.ne.s32.totalorder %s1808_s6, %s1809_s8  ;;  %s1814_s19 = scalar_lea.hbm %s2208_s0, 16 }
  0x33   : > { %p1815_p0 = scmp.lt.s32.totalorder %s1808_s6, %s2208_s0  ;;  %p1816_p2 = scmp.lt.s32.totalorder %s1814_s19, %s1809_s8 }
  0x34   : > { %p1812_p10 = pnand %p1811_p9, %p1810_p7 }
  0x35   : > { %p1817_p6 = por %p1816_p2, %p1815_p0 }
  0x36   : > { %p1813_p11 = pneg %p1812_p10 }
  0x38   : > { %p1818_p4 = pnand %p1817_p6, %p1813_p11 }
  0x3a   : > { %1821 = shalt.err (!%p1818_p4)
}
  0x3b   : > { %1581 = dma.hbm_to_vmem [thread:$0]  (!%p2092_p8), %s429_s12, 128, %s431_s13, %s419_s3  }
  0x3c   : > { %439 = sbr.rel (%p2021_p3) target bundleno = 1740 (0x6cc), region = 68  ;;  %s2109_s25 = sand.u32 (!%p2021_p3), 1, %s1907_s22  }
  0x3d   : > { %s1284_s27 = sshll.u32 (!%p2021_p3), %s2109_s25, 3  ;;  %s442_s26 = scalar_lea.sflag (!%p2021_p3), [#allocation3], %s2109_s25 }
  0x3e   : > { %s445_s6 = scalar_lea.vmem (!%p2021_p3), [#allocation2], %s1284_s27 }
  0x41   : > { %1882 = dma.done.wait (%p2074_p12), %s442_s26, 128  }
  0x42   : > { %1884 = vsyncadd (%p2074_p12), %s442_s26, 4294967168 }
  0x43   : > { %1886 = dma.done.wait (%p52_p1), [#allocation6], 3088  }
  0x44   : > { %1888 = vsyncadd (%p52_p1), [#allocation6], 4294964208 }
  0x45   : > { %1890 = dma.done.wait (%p52_p1), [#allocation9], 2048  }
  0x46   : > { %1892 = vsyncadd (%p52_p1), [#allocation9], 4294965248 }
  0x47   : > { %1894 = dma.done.wait (%p52_p1), [#allocation12], 1024  }
  0x48   : > { %1896 = vsyncadd (%p52_p1), [#allocation12], 4294966272  ;;  %v514_v0 = vlaneseq  ;;  %v1926_v2 = vmov 0.0   ;;  %v2133_v4 = vld [vmem:[%s445_s6] sm:$0xff]  ;;  %v1378_v6 = vld [vmem:[#allocation7 + $0xa8] sm:$0xf] }
  0x49   : > { %v1512_v7 = vld [vmem:[#allocation7 + $0xb0] sm:$0xf0]  ;;  %v1511_v8 = vld [vmem:[#allocation7 + $0xac] sm:$0xf]  ;;  %v1380_v10 = vld [vmem:[#allocation7 + $0xb4] sm:$0xf0] }
  0x4a   : > { %v515_v1 = vand.u32 127, %v514_v0  ;;  %v1379_v9 = vor.u32 %v1512_v7, %v1378_v6  ;;  %v1386_v11 = vld [vmem:[#allocation7 + $0xb0] sm:$0xf]  ;;  %v1513_v12 = vld [vmem:[#allocation7 + $0xb8] sm:$0xf0]  ;;  %v1383_v13 = vor.u32 %v1511_v8, %v1380_v10  ;;  %vm797_vm4 = vcmask 1043456  }
  0x4b   : > { %v1387_v14 = vor.u32 %v1513_v12, %v1386_v11  ;;  %v1366_v20 = vld [vmem:[#allocation7 + $0x90] sm:$0xf]  ;;  %v1509_v21 = vld [vmem:[#allocation7 + $0x98] sm:$0xf0]  ;;  %v1508_v22 = vld [vmem:[#allocation7 + $0x94] sm:$0xf] }
  0x4c   : > { %vm516_vm0 = vcmp.lt.s32.totalorder %v515_v1, 32  ;;  %712 = vmatpush.bf16.msra.mxu0 %v1379_v9  ;;  %725 = vmatpush.bf16.msra.mxu1 %v1383_v13  ;;  %v1367_v23 = vor.u32 %v1509_v21, %v1366_v20  ;;  %v1368_v24 = vld [vmem:[#allocation7 + $0x9c] sm:$0xf0]  ;;  %v1374_v25 = vld [vmem:[#allocation7 + $0x98] sm:$0xf]  ;;  %vm768_vm5 = vcmask 64512  }
  0x4d   : > { %v2131_v3 = vsel %vm516_vm0, 1.0, %v1926_v2  ;;  %738 = vmatpush.bf16.msra.mxu2 %v1387_v14  ;;  %v1510_v26 = vld [vmem:[#allocation7 + $0xa0] sm:$0xf0]  ;;  %v1371_v27 = vor.u32 %v1508_v22, %v1368_v24  ;;  %v1354_v29 = vld [vmem:[#allocation7 + $0x78] sm:$0xf]  ;;  %s1487_s1 = sshll.u32 %s2016_s28, 3 }
  0x4e   : > { %v521_v5 = vmul.f32 %v2131_v3, %v2133_v4  ;;  %v1375_v28 = vor.u32 %v1510_v26, %v1374_v25  ;;  %v1506_v30 = vld [vmem:[#allocation7 + $0x80] sm:$0xf0]  ;;  %v1505_v31 = vld [vmem:[#allocation7 + $0x7c] sm:$0xf]  ;;  %v1356_v33 = vld [vmem:[#allocation7 + $0x84] sm:$0xf0] }
  0x4f   : > { %v1355_v32 = vor.u32 %v1506_v30, %v1354_v29  ;;  %v1362_v34 = vld [vmem:[#allocation7 + $0x80] sm:$0xf]  ;;  %v1507_v35 = vld [vmem:[#allocation7 + $0x88] sm:$0xf0]  ;;  %v1359_v36 = vor.u32 %v1505_v31, %v1356_v33  ;;  %v1502_v40 = vld [vmem:[#allocation7 + $0x64] sm:$0xf] }
  0x50   : > { %522 = vadd.xlane.f32.xlu0 %v521_v5  ;;  %713 = vmatpush.bf16.msra.mxu0 %v1367_v23  ;;  %v1363_v37 = vor.u32 %v1507_v35, %v1362_v34  ;;  %v1342_v38 = vld [vmem:[#allocation7 + $0x60] sm:$0xf]  ;;  %v1503_v39 = vld [vmem:[#allocation7 + $0x68] sm:$0xf0]  ;;  %v1344_v42 = vld [vmem:[#allocation7 + $0x6c] sm:$0xf0] }
  0x51   : > { %726 = vmatpush.bf16.msra.mxu1 %v1371_v27  ;;  %739 = vmatpush.bf16.msra.mxu2 %v1375_v28  ;;  %v1343_v41 = vor.u32 %v1503_v39, %v1342_v38  ;;  %v1350_v43 = vld [vmem:[#allocation7 + $0x68] sm:$0xf]  ;;  %v1504_v44 = vld [vmem:[#allocation7 + $0x70] sm:$0xf0]  ;;  %v1347_v45 = vor.u32 %v1502_v40, %v1344_v42  ;;  %v1499_v49 = vld [vmem:[#allocation7 + $0x4c] sm:$0xf] }
  0x52   : > { %v1351_v46 = vor.u32 %v1504_v44, %v1350_v43  ;;  %v1330_v47 = vld [vmem:[#allocation7 + $0x48] sm:$0xf]  ;;  %v1500_v48 = vld [vmem:[#allocation7 + $0x50] sm:$0xf0]  ;;  %v1332_v51 = vld [vmem:[#allocation7 + $0x54] sm:$0xf0] }
  0x53   : > { %v1331_v50 = vor.u32 %v1500_v48, %v1330_v47  ;;  %v1338_v52 = vld [vmem:[#allocation7 + $0x50] sm:$0xf]  ;;  %v1501_v53 = vld [vmem:[#allocation7 + $0x58] sm:$0xf0]  ;;  %v1335_v54 = vor.u32 %v1499_v49, %v1332_v51  ;;  %v1496_v58 = vld [vmem:[#allocation7 + $0x34] sm:$0xf] }
  0x54   : > { %714 = vmatpush.bf16.msra.mxu0 %v1355_v32  ;;  %v1339_v55 = vor.u32 %v1501_v53, %v1338_v52  ;;  %v1318_v56 = vld [vmem:[#allocation7 + $0x30] sm:$0xf]  ;;  %v1497_v57 = vld [vmem:[#allocation7 + $0x38] sm:$0xf0]  ;;  %v1320_v60 = vld [vmem:[#allocation7 + $0x3c] sm:$0xf0] }
  0x55   : > { %727 = vmatpush.bf16.msra.mxu1 %v1359_v36  ;;  %740 = vmatpush.bf16.msra.mxu2 %v1363_v37  ;;  %v1319_v59 = vor.u32 %v1497_v57, %v1318_v56  ;;  %v1326_v61 = vld [vmem:[#allocation7 + $0x38] sm:$0xf]  ;;  %v1498_v62 = vld [vmem:[#allocation7 + $0x40] sm:$0xf0]  ;;  %v1323_v63 = vor.u32 %v1496_v58, %v1320_v60  ;;  %v1493_v5 = vld [vmem:[#allocation7 + $0x1c] sm:$0xf] }
  0x56   : > { %v1327_v0 = vor.u32 %v1498_v62, %v1326_v61  ;;  %v1306_v1 = vld [vmem:[#allocation7 + $0x18] sm:$0xf]  ;;  %v1494_v2 = vld [vmem:[#allocation7 + $0x20] sm:$0xf0]  ;;  %v1308_v7 = vld [vmem:[#allocation7 + $0x24] sm:$0xf0] }
  0x57   : > { %v1307_v6 = vor.u32 %v1494_v2, %v1306_v1  ;;  %v1314_v8 = vld [vmem:[#allocation7 + $0x20] sm:$0xf]  ;;  %v1495_v9 = vld [vmem:[#allocation7 + $0x28] sm:$0xf0]  ;;  %v1311_v10 = vor.u32 %v1493_v5, %v1308_v7  ;;  %v1490_v14 = vld [vmem:[#allocation7 + $0x4] sm:$0xf] }
  0x58   : > { %715 = vmatpush.bf16.msra.mxu0 %v1343_v41  ;;  %v1315_v11 = vor.u32 %v1495_v9, %v1314_v8  ;;  %v1294_v12 = vld [vmem:[#allocation7] sm:$0xf]  ;;  %v1491_v13 = vld [vmem:[#allocation7 + $0x8] sm:$0xf0]  ;;  %v1640_v31 = vld [vmem:[#allocation5] ss:$0 sm:$0xff] }
  0x59   : > { %728 = vmatpush.bf16.msra.mxu1 %v1347_v45  ;;  %741 = vmatpush.bf16.msra.mxu2 %v1351_v46  ;;  %v1641_v34 = vld [vmem:[%s2210_s2] ss:$0 sm:$0xff]  ;;  %v1521_v56 = vld [vmem:[#allocation8 + $0x38] sm:$0xff]  ;;  %v1520_v57 = vld [vmem:[#allocation8 + $0x30] sm:$0xff]  ;;  %s2239_s29 = sld [smem:[#allocation24_spill]]  ;;  %s511_s12 = scalar_lea.vmem [#allocation13], %s1284_s27 }
  0x5a   : > { %v1519_v58 = vld [vmem:[#allocation8 + $0x28] sm:$0xff]  ;;  %v1518_v60 = vld [vmem:[#allocation8 + $0x20] sm:$0xff]  ;;  %v1517_v61 = vld [vmem:[#allocation8 + $0x18] sm:$0xff]  ;;  %s1152_s13 = sshll.u32 %s511_s12, 4  ;;  %s1140_s28 = scalar_lea.sflag [#allocation4], %s2109_s25  ;;  %s1153_s13 = int_to_ptr.vmem [resolvable:$true] %s1152_s13 }
  0x5b   : > { %v1515_v7 = vld [vmem:[#allocation8 + $0x8] sm:$0xff] }
  0x5c   : > { %716 = vmatpush.bf16.msra.mxu0 %v1331_v50 }
  0x5d   : > { %729 = vmatpush.bf16.msra.mxu1 %v1335_v54  ;;  %742 = vmatpush.bf16.msra.mxu2 %v1339_v55 }
  0x5f   : > { %s1150_s17 = scalar_lea.hbm %s2239_s29, %s1487_s1  ;;  %s1857_s27 = scalar_lea.hbm %s2239_s29, 16 }
  0x60   : > { %717 = vmatpush.bf16.msra.mxu0 %v1319_v59  ;;  %s1154_s14 = sshll.u32 %s1150_s17, 4  ;;  %s1155_s14 = int_to_ptr.hbm [resolvable:$true] %s1154_s14 }
  0x61   : > { %730 = vmatpush.bf16.msra.mxu1 %v1323_v63  ;;  %743 = vmatpush.bf16.msra.mxu2 %v1327_v0  ;;  %v1516_v0 = vld [vmem:[#allocation8 + $0x10] sm:$0xff]  ;;  %s1851_s30 = sshra.s32 %s1155_s14, 4  ;;  %s1852_s30 = int_to_ptr.hbm [resolvable:$true] %s1851_s30 }
  0x62   : > { %s1853_s19 = scalar_lea.hbm %s1852_s30, 8  ;;  %p1858_p12 = scmp.lt.s32.totalorder %s1852_s30, %s2239_s29 }
  0x63   : > { %p1854_p1 = scmp.ne.s32.totalorder %s1852_s30, %s1853_s19  ;;  %p1859_p8 = scmp.lt.s32.totalorder %s1857_s27, %s1853_s19 }
  0x64   : > { %718 = vmatpush.bf16.msra.mxu0 %v1307_v6 }
  0x65   : > { %731 = vmatpush.bf16.msra.mxu1 %v1311_v10  ;;  %744 = vmatpush.bf16.msra.mxu2 %v1315_v11  ;;  %p1855_p3 = pnand %p1854_p1, %p2078_p13  ;;  %p1860_p7 = por %p1859_p8, %p1858_p12 }
  0x67   : > { %p1856_p4 = pneg %p1855_p3 }
  0x69   : > { %p1861_p9 = pnand %p1860_p7, %p1856_p4 }
  0xc3   : > { %v523_v15 = vpop.xlane.xlu0 %522 }
  0xc4   : > { %v524_v16 = vmul.f32 0.03125, %v523_v15  ;;  %v1295_v15 = vor.u32 %v1491_v13, %v1294_v12 }
  0xc6   : > { %v2138_v17 = vsub.f32 %v2133_v4, %v524_v16  ;;  %v1296_v16 = vld [vmem:[#allocation7 + $0xc] sm:$0xf0]  ;;  %719 = vmatpush.bf16.msra.mxu0 %v1295_v15 }
  0xc7   : > { %v1299_v20 = vor.u32 %v1490_v14, %v1296_v16  ;;  %v1514_v14 = vld [vmem:[#allocation8] sm:$0xff] }
  0xc8   : > { %v526_v18 = vmul.f32 %v2138_v17, %v2138_v17 }
  0xc9   : > { %732 = vmatpush.bf16.msra.mxu1 %v1299_v20 }
  0xca   : > { %v527_v19 = vmul.f32 %v2131_v3, %v526_v18  ;;  %v1302_v18 = vld [vmem:[#allocation7 + $0x8] sm:$0xf] }
  0xcc   : > { %528 = vadd.xlane.f32.xlu0 %v527_v19  ;;  %v1492_v19 = vld [vmem:[#allocation7 + $0x10] sm:$0xf0] }
  0xcd   : > { %v1303_v21 = vor.u32 %v1492_v19, %v1302_v18  ;;  %v1642_v19 = vld [vmem:[%s2213_s5] ss:$0 sm:$0xff] }
  0xcf   : > { %745 = vmatpush.bf16.msra.mxu2 %v1303_v21 }
 0x13f   : > { %v529_v22 = vpop.xlane.xlu0 %528 }
 0x140   : > { %v530_v23 = vmul.f32 0.03125, %v529_v22 }
 0x142   : > { %v531_v24 = vadd.f32 1e-05, %v530_v23 }
 0x144   : > { %1647 = vrsqrt.f32 %v531_v24  ;;  %vm538_vm2 = vweird.f32 %v531_v24 }
 0x14a   : > { %v1648_v25 = vpop.eup %1647 }
 0x14b   : > { %v533_v26 = vmul.f32 %v1648_v25, %v531_v24  ;;  %vm539_vm1 = vweird.f32 %v1648_v25 }
 0x14c   : > { %vm540_vm3 = vmor %vm538_vm2, %vm539_vm1 }
 0x14d   : > { %v534_v27 = vmul.f32 %v1648_v25, %v533_v26 }
 0x14f   : > { %v535_v28 = vmul.f32 0.5, %v534_v27 }
 0x151   : > { %v536_v29 = vsub.f32 1.5, %v535_v28 }
 0x153   : > { %v537_v30 = vmul.f32 %v1648_v25, %v536_v29 }
 0x155   : > { %v541_v32 = vsel %vm540_vm3, %v1648_v25, %v537_v30  ;;  %v1529_v25 = vld [vmem:[#allocation10 + $0x38] sm:$0xff] }
 0x156   : > { %v542_v33 = vmul.f32 %v541_v32, %v2138_v17  ;;  %998 = vmatpush.bf16.msrb.mxu0 %v1529_v25  ;;  %v1527_v32 = vld [vmem:[#allocation10 + $0x28] sm:$0xff] }
 0x158   : > { %v546_v35 = vmul.f32 %v1640_v31, %v542_v33  ;;  %v1528_v31 = vld [vmem:[#allocation10 + $0x30] sm:$0xff]  ;;  %v1526_v33 = vld [vmem:[#allocation10 + $0x20] sm:$0xff] }
 0x15a   : > { %v550_v36 = vadd.f32 %v1641_v34, %v546_v35  ;;  %999 = vmatpush.bf16.msrb.mxu0 %v1528_v31  ;;  %v1524_v34 = vld [vmem:[#allocation10 + $0x10] sm:$0xff]  ;;  %v1523_v35 = vld [vmem:[#allocation10 + $0x8] sm:$0xff] }
 0x15c   : > { %v551_v37 = vpack.c.bf16 %v550_v36, %v550_v36  ;;  %v1522_v36 = vld [vmem:[#allocation10] sm:$0xff] }
 0x15e   : > { %720 = vmatmul.bf16.vlgmr.msra.gmra.mxu0 %v551_v37  ;;  %733 = vmatmul.bf16.vlgmr.msra.gmra.mxu1 %v551_v37 }
 0x15f   : > { %746 = vmatmul.bf16.vlgmr.msra.gmra.mxu2 %v551_v37  ;;  %1000 = vmatpush.bf16.msrb.mxu0 %v1527_v32 }
 0x163   : > { %1001 = vmatpush.bf16.msrb.mxu0 %v1526_v33 }
 0x1db   : > { %v721_v38 = vpop.f32.mrf.mxu0  ;;  %v734_v39 = vpop.f32.mrf.mxu1 }
 0x1dc   : > { %v753_v40 = vpack.c.bf16 %v734_v39, %v734_v39  ;;  %v751_v41 = vmul.f32 0.17677669, %v721_v38 }
 0x1de   : > { %762 = vmatpush.bf16.xpose.msra.mxu3 %v753_v40  ;;  %v752_v43 = vpack.c.bf16 %v751_v41, %v751_v41 }
 0x1e2   : > { %v747_v42 = vpop.f32.mrf.mxu2 }
 0x1e3   : > { %v754_v44 = vpack.c.bf16 %v747_v42, %v747_v42  ;;  %v723_v17 = vpop.f32.mrf.mxu0  ;;  %v736_v45 = vpop.f32.mrf.mxu1 }
 0x1e4   : > { %v1643_v17 = vld [vmem:[%s2218_s10] ss:$0 sm:$0xff] }
 0x1e5   : > { %763 = vmatmul.bf16.vlgmr.msra.gmra.mxu3 %v752_v43  ;;  %v799_v46 = vsel %vm797_vm4, %v754_v44, 0 }
 0x1e6   : > { %808 = vmatpush.bf16.msrb.mxu3 %v799_v46 }
 0x1ea   : > { %v749_v47 = vpop.f32.mrf.mxu2  ;;  %883 = vmatpush.bf16.msra.mxu3 %v1521_v56 }
 0x1eb   : > { %v1644_v47 = vld [vmem:[%s2219_s11] ss:$0 sm:$0xff] }
 0x1ee   : > { %884 = vmatpush.bf16.msra.mxu3 %v1520_v57 }
 0x1f2   : > { %885 = vmatpush.bf16.msra.mxu3 %v1519_v58  ;;  %v1534_v58 = vld [vmem:[#allocation11 + $0x20] sm:$0xff] }
 0x1f6   : > { %886 = vmatpush.bf16.msra.mxu3 %v1518_v60 }
 0x1fa   : > { %887 = vmatpush.bf16.msra.mxu3 %v1517_v61 }
 0x1fe   : > { %888 = vmatpush.bf16.msra.mxu3 %v1516_v0 }
 0x202   : > { %889 = vmatpush.bf16.msra.mxu3 %v1515_v7 }
 0x206   : > { %890 = vmatpush.bf16.msra.mxu3 %v1514_v14 }
 0x268   : > { %v764_v48 = vpop.f32.mrf.mxu3 }
 0x269   : > { %v769_v49 = vsel %vm768_vm5, %v764_v48, -inf }
 0x26a   : > { %770 = vmax.xlane.f32.xlu1 %v769_v49 }
 0x270   : > { %v766_v50 = vpop.f32.mrf.mxu3 }
 0x2dd   : > { %v771_v51 = vpop.xlane.xlu1 %770 }
 0x2de   : > { %v772_v52 = vsub.f32 %v764_v48, %v771_v51  ;;  %v1537_v51 = vld [vmem:[#allocation11 + $0x38] sm:$0xff] }
 0x2df   : > { %1124 = vmatpush.bf16.msrb.mxu1 %v1537_v51 }
 0x2e0   : > { %v773_v53 = vmul.f32 1.442695, %v772_v52  ;;  %v1536_v52 = vld [vmem:[#allocation11 + $0x30] sm:$0xff] }
 0x2e2   : > { %1649 = vpow2.f32 %v773_v53  ;;  %v1645_v53 = vld [vmem:[%s2215_s7] ss:$0 sm:$0xff] }
 0x2e3   : > { %1125 = vmatpush.bf16.msrb.mxu1 %v1536_v52 }
 0x2e8   : > { %v1650_v54 = vpop.eup %1649 }
 0x2e9   : > { %v775_v55 = vsel %vm768_vm5, %v1650_v54, 0.0 }
 0x2ea   : > { %776 = vadd.xlane.f32.xlu1 %v775_v55  ;;  %v1535_v55 = vld [vmem:[#allocation11 + $0x28] sm:$0xff] }
 0x2eb   : > { %1126 = vmatpush.bf16.msrb.mxu1 %v1535_v55 }
 0x2ef   : > { %1127 = vmatpush.bf16.msrb.mxu1 %v1534_v58 }
 0x35d   : > { %v777_v59 = vpop.xlane.xlu1 %776 }
 0x35e   : > { %1651 = vrcp.f32 %v777_v59  ;;  %v789_v2 = vand.u32 2147483648, %v777_v59  ;;  %v787_v6 = vand.u32 2147483647, %v777_v59  ;;  %vm783_vm7 = vweird.f32 %v777_v59 }
 0x360   : > { %v790_v9 = vor.u32 1.1754944e-38, %v789_v2  ;;  %vm788_vm9 = vcmp.eq.f32.partialorder %v787_v6, 8.507059e+37 }
 0x364   : > { %v1652_v62 = vpop.eup %1651 }
 0x365   : > { %v779_v63 = vmul.f32 %v1652_v62, %v777_v59  ;;  %vm784_vm6 = vweird.f32 %v1652_v62 }
 0x366   : > { %vm785_vm8 = vmor %vm783_vm7, %vm784_vm6 }
 0x367   : > { %v780_v1 = vsub.f32 1.0, %v779_v63 }
 0x369   : > { %v781_v5 = vmul.f32 %v1652_v62, %v780_v1 }
 0x36b   : > { %v782_v8 = vadd.f32 %v1652_v62, %v781_v5  ;;  %v1532_v5 = vld [vmem:[#allocation11 + $0x10] sm:$0xff] }
 0x36d   : > { %v786_v10 = vsel %vm785_vm8, %v1652_v62, %v782_v8  ;;  %v1533_v62 = vld [vmem:[#allocation11 + $0x18] sm:$0xff]  ;;  %v1531_v8 = vld [vmem:[#allocation11 + $0x8] sm:$0xff] }
 0x36e   : > { %v791_v11 = vsel %vm788_vm9, %v790_v9, %v786_v10  ;;  %1128 = vmatpush.bf16.msrb.mxu1 %v1533_v62 }
 0x36f   : > { %v792_v12 = vmul.f32 %v1650_v54, %v791_v11 }
 0x371   : > { %v793_v13 = vpack.c.bf16 %v792_v12, %v792_v12  ;;  %v1530_v12 = vld [vmem:[#allocation11] sm:$0xff] }
 0x372   : > { %1129 = vmatpush.bf16.msrb.mxu1 %v1532_v5 }
 0x373   : > { %1388 = vmatmul.msk.bf16.vlgmr.msrb.gmra.mxu3 %vm768_vm5, %v793_v13 }
 0x376   : > { %1130 = vmatpush.bf16.msrb.mxu1 %v1531_v8 }
 0x37a   : > { %1131 = vmatpush.bf16.msrb.mxu1 %v1530_v12 }
 0x3f6   : > { %v810_v15 = vpop.f32.mrf.mxu3 }
 0x3f7   : > { %v814_v16 = vpack.c.bf16 %v810_v15, %v810_v15 }
 0x3f9   : > { %891 = vmatmul.bf16.vlgmr.msra.gmra.mxu3 %v814_v16 }
 0x3fe   : > { %v812_v18 = vpop.f32.mrf.mxu3 }
 0x47c   : > { %v892_v20 = vpop.f32.mrf.mxu3 }
 0x47d   : > { %v893_v21 = vadd.f32 %v1642_v19, %v892_v20 }
 0x47f   : > { %v896_v22 = vadd.f32 %v893_v21, %v2133_v4  ;;  %v1525_v4 = vld [vmem:[#allocation10 + $0x18] sm:$0xff] }
 0x480   : > { %1002 = vmatpush.bf16.msrb.mxu0 %v1525_v4 }
 0x481   : > { %v899_v23 = vmul.f32 %v2131_v3, %v896_v22 }
 0x483   : > { %900 = vadd.xlane.f32.xlu2 %v899_v23 }
 0x484   : > { %v894_v24 = vpop.f32.mrf.mxu3  ;;  %1003 = vmatpush.bf16.msrb.mxu0 %v1524_v34 }
 0x488   : > { %1004 = vmatpush.bf16.msrb.mxu0 %v1523_v35 }
 0x48c   : > { %1005 = vmatpush.bf16.msrb.mxu0 %v1522_v36 }
 0x4f6   : > { %v901_v26 = vpop.xlane.xlu2 %900 }
 0x4f7   : > { %v902_v27 = vmul.f32 0.03125, %v901_v26 }
 0x4f9   : > { %v903_v28 = vsub.f32 %v896_v22, %v902_v27 }
 0x4fb   : > { %v904_v29 = vmul.f32 %v903_v28, %v903_v28 }
 0x4fd   : > { %v905_v30 = vmul.f32 %v2131_v3, %v904_v29 }
 0x4ff   : > { %906 = vadd.xlane.f32.xlu2 %v905_v30 }
 0x572   : > { %v907_v37 = vpop.xlane.xlu2 %906 }
 0x573   : > { %v908_v38 = vmul.f32 0.03125, %v907_v37 }
 0x575   : > { %v909_v39 = vadd.f32 1e-05, %v908_v38 }
 0x577   : > { %1653 = vrsqrt.f32 %v909_v39  ;;  %vm916_vm11 = vweird.f32 %v909_v39 }
 0x57d   : > { %v1654_v3 = vpop.eup %1653 }
 0x57e   : > { %v911_v40 = vmul.f32 %v1654_v3, %v909_v39  ;;  %vm917_vm10 = vweird.f32 %v1654_v3 }
 0x57f   : > { %vm918_vm12 = vmor %vm916_vm11, %vm917_vm10 }
 0x580   : > { %v912_v41 = vmul.f32 %v1654_v3, %v911_v40  ;;  %v1646_v40 = vld [vmem:[%s2217_s9] ss:$0 sm:$0xff] }
 0x582   : > { %v913_v42 = vmul.f32 0.5, %v912_v41 }
 0x584   : > { %v914_v43 = vsub.f32 1.5, %v913_v42 }
 0x586   : > { %v915_v44 = vmul.f32 %v1654_v3, %v914_v43 }
 0x588   : > { %v919_v45 = vsel %vm918_vm12, %v1654_v3, %v915_v44 }
 0x589   : > { %v920_v46 = vmul.f32 %v919_v45, %v903_v28 }
 0x58b   : > { %v924_v48 = vmul.f32 %v1643_v17, %v920_v46 }
 0x58d   : > { %v2162_v49 = vadd.f32 %v1644_v47, %v924_v48 }
 0x58f   : > { %v929_v50 = vpack.c.bf16 %v2162_v49, %v2162_v49 }
 0x591   : > { %1006 = vmatmul.bf16.vlgmr.msrb.gmra.mxu0 %v929_v50 }
 0x60e   : > { %v1007_v54 = vpop.f32.mrf.mxu0 }
 0x60f   : > { %v1008_v56 = vadd.f32 %v1645_v53, %v1007_v54 }
 0x611   : > { %v1012_v57 = vmul.f32 0.70710677, %v1008_v56  ;;  %v1011_v37 = vmul.f32 0.5, %v1008_v56 }
 0x613   : > { %v1013_v59 = vmul.f32 %v1012_v57, %v1012_v57 }
 0x615   : > { %v1014_v60 = vmin.f32 %v1013_v59, 16.0 }
 0x616   : > { %v1009_v61 = vpop.f32.mrf.mxu0 }
 0x617   : > { %v1015_v63 = vmul.f32 2.1237322e-06, %v1014_v60  ;;  %v1026_v0 = vmul.f32 3.8918573e-05, %v1014_v60 }
 0x619   : > { %v1016_v1 = vadd.f32 0.00028619796, %v1015_v63  ;;  %v1027_v2 = vadd.f32 0.001143296, %v1026_v0 }
 0x61b   : > { %v1017_v6 = vmul.f32 %v1016_v1, %v1014_v60  ;;  %v1028_v7 = vmul.f32 %v1027_v2, %v1014_v60 }
 0x61d   : > { %v1029_v9 = vadd.f32 0.014752088, %v1028_v7  ;;  %v1018_v10 = vadd.f32 0.0036580483, %v1017_v6 }
 0x61f   : > { %v1030_v11 = vmul.f32 %v1029_v9, %v1014_v60  ;;  %v1019_v14 = vmul.f32 %v1018_v10, %v1014_v60 }
 0x621   : > { %v1031_v13 = vadd.f32 0.112945676, %v1030_v11  ;;  %v1020_v18 = vadd.f32 0.05243302, %v1019_v14 }
 0x623   : > { %v1032_v15 = vmul.f32 %v1031_v13, %v1014_v60  ;;  %v1021_v21 = vmul.f32 %v1020_v18, %v1014_v60 }
 0x625   : > { %v1033_v16 = vadd.f32 0.4994258, %v1032_v15  ;;  %v1022_v22 = vadd.f32 0.18741608, %v1021_v21 }
 0x627   : > { %v1034_v19 = vmul.f32 %v1033_v16, %v1014_v60  ;;  %v1023_v24 = vmul.f32 %v1022_v22, %v1014_v60 }
 0x629   : > { %v1035_v20 = vadd.f32 1.0, %v1034_v19  ;;  %v1024_v28 = vadd.f32 1.1283791, %v1023_v24 }
 0x62b   : > { %1655 = vrcp.f32 %v1035_v20  ;;  %v1047_v27 = vand.u32 2147483648, %v1035_v20  ;;  %v1045_v30 = vand.u32 2147483647, %v1035_v20  ;;  %vm1041_vm14 = vweird.f32 %v1035_v20 }
 0x62c   : > { %v1025_v33 = vmul.f32 %v1024_v28, %v1012_v57 }
 0x62d   : > { %v1048_v32 = vor.u32 1.1754944e-38, %v1047_v27  ;;  %vm1046_vm0 = vcmp.eq.f32.partialorder %v1045_v30, 8.507059e+37 }
 0x631   : > { %v1656_v23 = vpop.eup %1655 }
 0x632   : > { %v1037_v25 = vmul.f32 %v1656_v23, %v1035_v20  ;;  %vm1042_vm13 = vweird.f32 %v1656_v23 }
 0x633   : > { %vm1043_vm15 = vmor %vm1041_vm14, %vm1042_vm13 }
 0x634   : > { %v1038_v26 = vsub.f32 1.0, %v1037_v25 }
 0x636   : > { %v1039_v29 = vmul.f32 %v1656_v23, %v1038_v26 }
 0x638   : > { %v1040_v31 = vadd.f32 %v1656_v23, %v1039_v29 }
 0x63a   : > { %v1044_v4 = vsel %vm1043_vm15, %v1656_v23, %v1040_v31 }
 0x63b   : > { %v1049_v34 = vsel %vm1046_vm0, %v1048_v32, %v1044_v4 }
 0x63c   : > { %v1050_v35 = vmul.f32 %v1049_v34, %v1025_v33 }
 0x63e   : > { %v1453_v36 = vclamps-f32 %v1050_v35, 1.0 }
 0x640   : > { %v1053_v38 = vadd.f32 1.0, %v1453_v36 }
 0x642   : > { %v1054_v39 = vmul.f32 %v1053_v38, %v1011_v37 }
 0x644   : > { %v1055_v3 = vpack.c.bf16 %v1054_v39, %v1054_v39 }
 0x646   : > { %1132 = vmatmul.bf16.vlgmr.msrb.gmra.mxu1 %v1055_v3 }
 0x6c3   : > { %v1133_v41 = vpop.f32.mrf.mxu1 }
 0x6c4   : > { %v1134_v42 = vadd.f32 %v1646_v40, %v1133_v41 }
 0x6c6   : > { %v1137_v43 = vadd.f32 %v1134_v42, %v2162_v49 }
 0x6c8   : > { %1138 = vst [vmem:[%s511_s12] sm:$0xff] %v1137_v43 }
 0x6c9   : > { %1864 = shalt.err (!%p1861_p9)
}
 0x6ca   : > { %1560 = dma.vmem_to_hbm [thread:$0]  (%p2078_p13), %s1153_s13, 128, %s1155_s14, %s1140_s28  }
 0x6cb   : > { %v1135_v44 = vpop.f32.mrf.mxu1 }
 0x6cc PF: > { %s1166_s25 = sand.u32 1, %s1903_s21   ;;  %p2240_p10 = scmp.ge.s32.totalorder %s1915_s24, 2 }
 0x6cd   : > { %s1167_s3 = scalar_lea.sflag [#allocation4], %s1166_s25 }
 0x6ce   : > { %p1583_p11 = pnand %p2240_p10, %p2083_p5 }
 0x6d0   : > { %p1584_p0 = pneg %p1583_p11 }
 0x6d2   : > { %1898 = dma.done.wait (%p1584_p0), %s1167_s3, 128  }
 0x6d3   : > { %1900 = vsyncadd (%p1584_p0), %s1167_s3, 4294967168  ;;  %p28_p2 = scmp.ge.s32.totalorder %s2058_s15, 4   ;;  %s2241_s21 = smov %s1907_s22 }
 0x6d4   : > { %s2242_s22 = smov %s1911_s23  ;;  %s2243_s23 = smov %s2070_s18 }
 0x6d5   : > { %s2244_s24 = smov %s2058_s15  ;;  %30 = sbr.rel (!%p28_p2) target bundleno = 15 (0xf), region = 133 }
 0x6da   :  { %1173 = vsyncpa [#allocation3], 1 }
 0x6db   :  { %1175 = vsyncpa [#allocation3 + $0x1], 1 }
 0x6dc   :  { %1176 = vsyncpa [#allocation6], 1 }
 0x6dd   :  { %1177 = vsyncpa [#allocation9], 1 }
 0x6de   :  { %1178 = vsyncpa [#allocation12], 1 }
 0x6df   :  { %1179 = vsyncpa [#allocation4], 1 }
 0x6e0   :  { %1181 = vsyncpa [#allocation4 + $0x1], 1 }

</bundles_post_ra>
